<compile_context>
chip_gen: v7x
topology: tpu7x:2x2x1
jax: 0.10.0
libtpu: 0.0.40
codegen_flags: <defaults>
</compile_context>

<pallas_src>
import functools

import jax
import jax.numpy as jnp
import numpy as np
from jax.experimental import pallas as pl
from jax.experimental.pallas import tpu as pltpu


def _round_up(v, m):
    return (v + m - 1) // m * m


def charm_fused_kernel(x_ref, masks_ref,
                       w1_ref, b1_ref, w2_ref, b2_ref, w3_ref, b3_ref,
                       o_ref, *, W, matmul_dtype):
    """Fused conv3x3+ReLU -> conv3x3+ReLU -> conv3x3 on one packed batch chunk.

    x_ref:     (Cin_p, L)        L = NB*H*W lanes; NB images packed image-major
    masks_ref: (9, 1, L) f32     per-tap {0,1} validity masks (zero every lane
                                 whose tap source lies outside its own image)
    wN_ref:    (CoutN_p, 9*CinN_p)  im2col weights, tap-major (t = kh*3 + kw)
    bN_ref:    (CoutN_p, 1) f32
    o_ref:     (Cout3_p, L)
    """

    def conv3x3(a, w_ref, b_ref, relu):
        # a: (Cin_p, L) f32  ->  (Cout_p, L) f32
        L = a.shape[1]
        pieces = []
        for t in range(9):
            dh, dw = t // 3 - 1, t % 3 - 1
            d = dh * W + dw                      # flat lane shift of this tap
            if d == 0:
                piece = a                        # center tap: no shift, no mask
            else:
                # XLU lane rotation; the per-tap mask kills every lane whose
                # source (h+dh, w+dw) falls outside its own image, so neither
                # the roll wrap-around nor cross-image bleed leaks into the
                # output (this *is* the conv's zero padding, done in-register).
                piece = pltpu.roll(a, (-d) % L, axis=1) * masks_ref[t]
            # Cast at the slab boundary: shift/mask stay f32 (exact, cheap on
            # v5e too); the materialized slab is matmul_dtype (half the bytes).
            pieces.append(piece.astype(matmul_dtype))
        # Sublane-aligned concat (Cin_p is a multiple of the matmul dtype's
        # sublane tile) -> ONE MXU contraction per layer for the whole chunk.
        slab = jnp.concatenate(pieces, axis=0)                   # (9*Cin_p, L)
        out = jnp.dot(w_ref[...], slab, preferred_element_type=jnp.float32)
        out = out + b_ref[...]
        if relu:
            out = jnp.maximum(out, 0.0)
        return out

    a = x_ref[...].astype(jnp.float32)
    a = conv3x3(a, w1_ref, b1_ref, relu=True)
    a = conv3x3(a, w2_ref, b2_ref, relu=True)
    a = conv3x3(a, w3_ref, b3_ref, relu=False)
    o_ref[...] = a.astype(o_ref.dtype)                           # lane-dense store


def charm_block_half(x_nchw, params, *, matmul_dtype=jnp.bfloat16,
                     max_chunk_lanes=2048):
    """Forward pass of ChARMBlockHalf.  Input/output are NCHW (PyTorch convention)."""
    assert len(params) == 3
    N, cin, H, W = x_nchw.shape
    HW = H * W
    out_dim = params[-1][0].shape[0]

    # Fail loudly instead of producing masked partial stores for odd sizes.
    assert HW % 128 == 0, f"H*W={HW} must be a multiple of 128 for the lane-dense layout"

    # Sublane tile of the matmul dtype (8 rows f32, 16 rows bf16): channel pads
    # to this multiple keep every sublane concat / MXU operand tile-aligned.
    sub = 32 // jnp.dtype(matmul_dtype).itemsize

    # ---- batch packing: NB images per grid step, batch*spatial on lanes ------
    nb = max(1, min(N, max_chunk_lanes // HW))
    while N % nb:
        nb -= 1
    L = nb * HW                                   # lanes per grid step
    grid = (N // nb,)

    # ---- wrapper-side prep: tiny tensors only, no full-activation HBM pass ---
    cin_p = _round_up(cin, sub)
    # (N, C, H, W) -> (C, N*HW): batch packed into the lane axis, image-major.
    x_packed = x_nchw.reshape(N, cin, HW).transpose(1, 0, 2).reshape(cin, N * HW)
    if cin_p != cin:
        x_packed = jnp.pad(x_packed, ((0, cin_p - cin), (0, 0)))
    x_packed = x_packed.astype(matmul_dtype)      # halves the per-step input DMA

    w_mats, biases = [], []
    prev_cp = cin_p
    for w_oihw, b in params:                      # OIHW like nn.Conv2d
        co, ci = w_oihw.shape[:2]
        ci_p, co_p = _round_up(ci, sub), _round_up(co, sub)
        assert ci_p == prev_cp
        w_p = jnp.pad(w_oihw, ((0, co_p - co), (0, ci_p - ci), (0, 0), (0, 0)))
        # (co_p, ci_p, 3, 3) -> (co_p, kh, kw, ci_p) -> (co_p, 9*ci_p), tap-major.
        w_mats.append(jnp.transpose(w_p, (0, 2, 3, 1))
                      .reshape(co_p, 9 * ci_p).astype(matmul_dtype))
        biases.append(jnp.pad(b, (0, co_p - co)).reshape(co_p, 1).astype(jnp.float32))
        prev_cp = co_p
    cout_p = prev_cp

    # Per-tap {0,1} validity masks (combined row + column edge masks): lane p is
    # kept iff (h+dh, w+dw) stays inside the image.  Tiled over the nb images of
    # a chunk so shifted taps can neither wrap the chunk nor bleed across images.
    h_of = np.repeat(np.arange(H), W)
    w_of = np.tile(np.arange(W), H)
    masks_np = np.empty((9, HW), np.float32)
    for t in range(9):
        dh, dw = t // 3 - 1, t % 3 - 1
        ok = ((h_of + dh >= 0) & (h_of + dh < H) &
              (w_of + dw >= 0) & (w_of + dw < W))
        masks_np[t] = ok.astype(np.float32)
    masks = jnp.asarray(np.tile(masks_np, (1, nb)).reshape(9, 1, L))

    def resident(arr):      # tiny constant operand: whole array, stays in VMEM
        nd = arr.ndim
        return pl.BlockSpec(arr.shape, lambda c: (0,) * nd)

    out_packed = pl.pallas_call(
        functools.partial(charm_fused_kernel, W=W, matmul_dtype=matmul_dtype),
        out_shape=jax.ShapeDtypeStruct((cout_p, N * HW), x_nchw.dtype),
        grid=grid,
        in_specs=[
            pl.BlockSpec((cin_p, L), lambda c: (0, c)),
            resident(masks),
            resident(w_mats[0]), resident(biases[0]),
            resident(w_mats[1]), resident(biases[1]),
            resident(w_mats[2]), resident(biases[2]),
        ],
        out_specs=pl.BlockSpec((cout_p, L), lambda c: (0, c)),
        compiler_params=pltpu.CompilerParams(
            dimension_semantics=("parallel",)),
    )(x_packed, masks, w_mats[0], biases[0], w_mats[1], biases[1],
      w_mats[2], biases[2])

    # (cout_p, N*HW) -> (N, out_dim, H, W); drop the channel pad before the
    # (tiny) unpack transpose so we don't move padded rows around.
    out = out_packed[:out_dim].reshape(out_dim, N, HW).transpose(1, 0, 2)
    return out.reshape(N, out_dim, H, W)


def make_charm_block_half_params(key, in_dim, out_dim, dtype=jnp.float32):
    """Deterministic synthetic parameters matching ChARMBlockHalf.__init__ (OIHW)."""
    c1 = (out_dim - in_dim) // 3 + in_dim
    c2 = 2 * (out_dim - in_dim) // 3 + in_dim
    dims = [(in_dim, c1), (c1, c2), (c2, out_dim)]
    params = []
    for i, (ci, co) in enumerate(dims):
        kw_key, kb_key = jax.random.split(jax.random.fold_in(key, i))
        w = jax.random.normal(kw_key, (co, ci, 3, 3), dtype) * 0.1   # OIHW like nn.Conv2d
        b = jax.random.normal(kb_key, (co,), dtype) * 0.1
        params.append((w, b))
    return params


def _reference_charm_block_half(x_nchw, params):
    """Pure-JAX reference (lax conv, highest precision) for correctness checks."""
    x = x_nchw
    for i, (w, b) in enumerate(params):
        x = jax.lax.conv_general_dilated(
            x, w, window_strides=(1, 1), padding="SAME",
            dimension_numbers=("NCHW", "OIHW", "NCHW"),
            precision=jax.lax.Precision.HIGHEST)
        x = x + b.reshape(1, -1, 1, 1)
        if i < len(params) - 1:
            x = jnp.maximum(x, 0.0)
    return x


if __name__ == "__main__":
    in_dim, out_dim = 4, 16          # -> c1 = 8, c2 = 12
    N, H, W = 2, 16, 16

    key = jax.random.PRNGKey(0)
    kx, kp = jax.random.split(key)
    x = jax.random.normal(kx, (N, in_dim, H, W), jnp.float32)
    params = make_charm_block_half_params(kp, in_dim, out_dim)

    ref = _reference_charm_block_half(x, params)

    # Structural check: f32 MXU-operand path vs the lax.conv reference.  Any
    # shift / mask / im2col-indexing bug produces O(0.1 .. 1) errors; the
    # tolerance only has to absorb MXU f32 pass-configuration differences.
    fwd_f32 = jax.jit(lambda xx, pp: charm_block_half(xx, pp, matmul_dtype=jnp.float32))
    out_f32 = jax.block_until_ready(fwd_f32(x, params))
    assert out_f32.shape == (N, out_dim, H, W), out_f32.shape
    assert jnp.allclose(out_f32, ref, atol=3e-2, rtol=3e-2), (
        float(jnp.max(jnp.abs(out_f32 - ref))))

    # Default fast path: bf16 MXU operands / bf16 im2col slab, f32 accumulation
    # (native rate on v5e/v6e/v7x).  Tolerance loosened for bf16 mantissa.
    fwd = jax.jit(charm_block_half)
    out = jax.block_until_ready(fwd(x, params))
    assert out.shape == (N, out_dim, H, W), out.shape
    assert jnp.allclose(out, ref, atol=5e-2, rtol=5e-2), (
        float(jnp.max(jnp.abs(out - ref))))

    print("KERNEL_OK")
</pallas_src>

<mosaic_0001>
module attributes {stable_mosaic.version = 11 : i64} {
  func.func @charm_fused_kernel(%arg0: i32, %arg1: memref<8x512xf32, #tpu.memory_space<vmem>>, %arg2: memref<9x1x512xf32, #tpu.memory_space<vmem>>, %arg3: memref<8x72xf32, #tpu.memory_space<vmem>>, %arg4: memref<8x1xf32, #tpu.memory_space<vmem>>, %arg5: memref<16x72xf32, #tpu.memory_space<vmem>>, %arg6: memref<16x1xf32, #tpu.memory_space<vmem>>, %arg7: memref<16x144xf32, #tpu.memory_space<vmem>>, %arg8: memref<16x1xf32, #tpu.memory_space<vmem>>, %arg9: memref<16x512xf32, #tpu.memory_space<vmem>>) attributes {dimension_semantics = [#tpu.dimension_semantics<parallel>], iteration_bounds = array<i64: 1>, scalar_prefetch = 0 : i64, scratch_operands = 0 : i64, tpu.core_type = #tpu.core_type<tc>, window_params = [{transform_indices = @transform_0, window_bounds = array<i64: 8, 512>}, {pipeline_mode = #tpu.pipeline_mode<synchronous>, transform_indices = @transform_1, window_bounds = array<i64: 9, 1, 512>}, {pipeline_mode = #tpu.pipeline_mode<synchronous>, transform_indices = @transform_2, window_bounds = array<i64: 8, 72>}, {pipeline_mode = #tpu.pipeline_mode<synchronous>, transform_indices = @transform_3, window_bounds = array<i64: 8, 1>}, {pipeline_mode = #tpu.pipeline_mode<synchronous>, transform_indices = @transform_4, window_bounds = array<i64: 16, 72>}, {pipeline_mode = #tpu.pipeline_mode<synchronous>, transform_indices = @transform_5, window_bounds = array<i64: 16, 1>}, {pipeline_mode = #tpu.pipeline_mode<synchronous>, transform_indices = @transform_6, window_bounds = array<i64: 16, 144>}, {pipeline_mode = #tpu.pipeline_mode<synchronous>, transform_indices = @transform_7, window_bounds = array<i64: 16, 1>}, {transform_indices = @transform_8, window_bounds = array<i64: 16, 512>}]} {
    %c0 = arith.constant 0 : index
    %c0_0 = arith.constant 0 : index
    %0 = vector.load %arg1[%c0, %c0_0] : memref<8x512xf32, #tpu.memory_space<vmem>>, vector<8x512xf32>
    %c17_i32 = arith.constant 17 : i32
    %1 = tpu.dynamic_rotate %0 by %c17_i32 dim 1 : vector<8x512xf32>, i32 -> vector<8x512xf32>
    %c0_1 = arith.constant 0 : index
    %c0_2 = arith.constant 0 : index
    %c0_3 = arith.constant 0 : index
    %2 = vector.load %arg2[%c0_1, %c0_2, %c0_3] : memref<9x1x512xf32, #tpu.memory_space<vmem>>, vector<1x1x512xf32>
    %3 = vector.shape_cast %2 : vector<1x1x512xf32> to vector<1x512xf32>
    %4 = vector.broadcast %3 : vector<1x512xf32> to vector<8x512xf32>
    %5 = arith.mulf %1, %4 : vector<8x512xf32>
    %c16_i32 = arith.constant 16 : i32
    %6 = tpu.dynamic_rotate %0 by %c16_i32 dim 1 : vector<8x512xf32>, i32 -> vector<8x512xf32>
    %c1 = arith.constant 1 : index
    %c0_4 = arith.constant 0 : index
    %c0_5 = arith.constant 0 : index
    %7 = vector.load %arg2[%c1, %c0_4, %c0_5] : memref<9x1x512xf32, #tpu.memory_space<vmem>>, vector<1x1x512xf32>
    %8 = vector.shape_cast %7 : vector<1x1x512xf32> to vector<1x512xf32>
    %9 = vector.broadcast %8 : vector<1x512xf32> to vector<8x512xf32>
    %10 = arith.mulf %6, %9 : vector<8x512xf32>
    %c15_i32 = arith.constant 15 : i32
    %11 = tpu.dynamic_rotate %0 by %c15_i32 dim 1 : vector<8x512xf32>, i32 -> vector<8x512xf32>
    %c2 = arith.constant 2 : index
    %c0_6 = arith.constant 0 : index
    %c0_7 = arith.constant 0 : index
    %12 = vector.load %arg2[%c2, %c0_6, %c0_7] : memref<9x1x512xf32, #tpu.memory_space<vmem>>, vector<1x1x512xf32>
    %13 = vector.shape_cast %12 : vector<1x1x512xf32> to vector<1x512xf32>
    %14 = vector.broadcast %13 : vector<1x512xf32> to vector<8x512xf32>
    %15 = arith.mulf %11, %14 : vector<8x512xf32>
    %c1_i32 = arith.constant 1 : i32
    %16 = tpu.dynamic_rotate %0 by %c1_i32 dim 1 : vector<8x512xf32>, i32 -> vector<8x512xf32>
    %c3 = arith.constant 3 : index
    %c0_8 = arith.constant 0 : index
    %c0_9 = arith.constant 0 : index
    %17 = vector.load %arg2[%c3, %c0_8, %c0_9] : memref<9x1x512xf32, #tpu.memory_space<vmem>>, vector<1x1x512xf32>
    %18 = vector.shape_cast %17 : vector<1x1x512xf32> to vector<1x512xf32>
    %19 = vector.broadcast %18 : vector<1x512xf32> to vector<8x512xf32>
    %20 = arith.mulf %16, %19 : vector<8x512xf32>
    %c511_i32 = arith.constant 511 : i32
    %21 = tpu.dynamic_rotate %0 by %c511_i32 dim 1 : vector<8x512xf32>, i32 -> vector<8x512xf32>
    %c5 = arith.constant 5 : index
    %c0_10 = arith.constant 0 : index
    %c0_11 = arith.constant 0 : index
    %22 = vector.load %arg2[%c5, %c0_10, %c0_11] : memref<9x1x512xf32, #tpu.memory_space<vmem>>, vector<1x1x512xf32>
    %23 = vector.shape_cast %22 : vector<1x1x512xf32> to vector<1x512xf32>
    %24 = vector.broadcast %23 : vector<1x512xf32> to vector<8x512xf32>
    %25 = arith.mulf %21, %24 : vector<8x512xf32>
    %c497_i32 = arith.constant 497 : i32
    %26 = tpu.dynamic_rotate %0 by %c497_i32 dim 1 : vector<8x512xf32>, i32 -> vector<8x512xf32>
    %c6 = arith.constant 6 : index
    %c0_12 = arith.constant 0 : index
    %c0_13 = arith.constant 0 : index
    %27 = vector.load %arg2[%c6, %c0_12, %c0_13] : memref<9x1x512xf32, #tpu.memory_space<vmem>>, vector<1x1x512xf32>
    %28 = vector.shape_cast %27 : vector<1x1x512xf32> to vector<1x512xf32>
    %29 = vector.broadcast %28 : vector<1x512xf32> to vector<8x512xf32>
    %30 = arith.mulf %26, %29 : vector<8x512xf32>
    %c496_i32 = arith.constant 496 : i32
    %31 = tpu.dynamic_rotate %0 by %c496_i32 dim 1 : vector<8x512xf32>, i32 -> vector<8x512xf32>
    %c7 = arith.constant 7 : index
    %c0_14 = arith.constant 0 : index
    %c0_15 = arith.constant 0 : index
    %32 = vector.load %arg2[%c7, %c0_14, %c0_15] : memref<9x1x512xf32, #tpu.memory_space<vmem>>, vector<1x1x512xf32>
    %33 = vector.shape_cast %32 : vector<1x1x512xf32> to vector<1x512xf32>
    %34 = vector.broadcast %33 : vector<1x512xf32> to vector<8x512xf32>
    %35 = arith.mulf %31, %34 : vector<8x512xf32>
    %c495_i32 = arith.constant 495 : i32
    %36 = tpu.dynamic_rotate %0 by %c495_i32 dim 1 : vector<8x512xf32>, i32 -> vector<8x512xf32>
    %c8 = arith.constant 8 : index
    %c0_16 = arith.constant 0 : index
    %c0_17 = arith.constant 0 : index
    %37 = vector.load %arg2[%c8, %c0_16, %c0_17] : memref<9x1x512xf32, #tpu.memory_space<vmem>>, vector<1x1x512xf32>
    %38 = vector.shape_cast %37 : vector<1x1x512xf32> to vector<1x512xf32>
    %39 = vector.broadcast %38 : vector<1x512xf32> to vector<8x512xf32>
    %40 = arith.mulf %36, %39 : vector<8x512xf32>
    %41 = tpu.concatenate %5, %10, %15, %20, %0, %25, %30, %35, %40 in 0 : vector<8x512xf32>, vector<8x512xf32>, vector<8x512xf32>, vector<8x512xf32>, vector<8x512xf32>, vector<8x512xf32>, vector<8x512xf32>, vector<8x512xf32>, vector<8x512xf32> -> vector<72x512xf32>
    %c0_18 = arith.constant 0 : index
    %c0_19 = arith.constant 0 : index
    %42 = vector.load %arg3[%c0_18, %c0_19] : memref<8x72xf32, #tpu.memory_space<vmem>>, vector<8x72xf32>
    %cst = arith.constant dense<0.000000e+00> : vector<8x512xf32>
    %43 = tpu.matmul %42, %41, %cst {dimension_numbers = #tpu.dot_dimension_numbers<[1], [0], [0], [1], [0, 0, 1, 1], [], []>} : vector<8x72xf32>, vector<72x512xf32>, vector<8x512xf32> -> vector<8x512xf32>
    %c0_20 = arith.constant 0 : index
    %c0_21 = arith.constant 0 : index
    %44 = vector.load %arg4[%c0_20, %c0_21] : memref<8x1xf32, #tpu.memory_space<vmem>>, vector<8x1xf32>
    %45 = vector.broadcast %44 : vector<8x1xf32> to vector<8x512xf32>
    %46 = arith.addf %43, %45 : vector<8x512xf32>
    %cst_22 = arith.constant 0.000000e+00 : f32
    %47 = vector.broadcast %cst_22 : f32 to vector<8x512xf32>
    %48 = arith.maximumf %46, %47 : vector<8x512xf32>
    %c17_i32_23 = arith.constant 17 : i32
    %49 = tpu.dynamic_rotate %48 by %c17_i32_23 dim 1 : vector<8x512xf32>, i32 -> vector<8x512xf32>
    %c0_24 = arith.constant 0 : index
    %c0_25 = arith.constant 0 : index
    %c0_26 = arith.constant 0 : index
    %50 = vector.load %arg2[%c0_24, %c0_25, %c0_26] : memref<9x1x512xf32, #tpu.memory_space<vmem>>, vector<1x1x512xf32>
    %51 = vector.shape_cast %50 : vector<1x1x512xf32> to vector<1x512xf32>
    %52 = vector.broadcast %51 : vector<1x512xf32> to vector<8x512xf32>
    %53 = arith.mulf %49, %52 : vector<8x512xf32>
    %c16_i32_27 = arith.constant 16 : i32
    %54 = tpu.dynamic_rotate %48 by %c16_i32_27 dim 1 : vector<8x512xf32>, i32 -> vector<8x512xf32>
    %c1_28 = arith.constant 1 : index
    %c0_29 = arith.constant 0 : index
    %c0_30 = arith.constant 0 : index
    %55 = vector.load %arg2[%c1_28, %c0_29, %c0_30] : memref<9x1x512xf32, #tpu.memory_space<vmem>>, vector<1x1x512xf32>
    %56 = vector.shape_cast %55 : vector<1x1x512xf32> to vector<1x512xf32>
    %57 = vector.broadcast %56 : vector<1x512xf32> to vector<8x512xf32>
    %58 = arith.mulf %54, %57 : vector<8x512xf32>
    %c15_i32_31 = arith.constant 15 : i32
    %59 = tpu.dynamic_rotate %48 by %c15_i32_31 dim 1 : vector<8x512xf32>, i32 -> vector<8x512xf32>
    %c2_32 = arith.constant 2 : index
    %c0_33 = arith.constant 0 : index
    %c0_34 = arith.constant 0 : index
    %60 = vector.load %arg2[%c2_32, %c0_33, %c0_34] : memref<9x1x512xf32, #tpu.memory_space<vmem>>, vector<1x1x512xf32>
    %61 = vector.shape_cast %60 : vector<1x1x512xf32> to vector<1x512xf32>
    %62 = vector.broadcast %61 : vector<1x512xf32> to vector<8x512xf32>
    %63 = arith.mulf %59, %62 : vector<8x512xf32>
    %c1_i32_35 = arith.constant 1 : i32
    %64 = tpu.dynamic_rotate %48 by %c1_i32_35 dim 1 : vector<8x512xf32>, i32 -> vector<8x512xf32>
    %c3_36 = arith.constant 3 : index
    %c0_37 = arith.constant 0 : index
    %c0_38 = arith.constant 0 : index
    %65 = vector.load %arg2[%c3_36, %c0_37, %c0_38] : memref<9x1x512xf32, #tpu.memory_space<vmem>>, vector<1x1x512xf32>
    %66 = vector.shape_cast %65 : vector<1x1x512xf32> to vector<1x512xf32>
    %67 = vector.broadcast %66 : vector<1x512xf32> to vector<8x512xf32>
    %68 = arith.mulf %64, %67 : vector<8x512xf32>
    %c511_i32_39 = arith.constant 511 : i32
    %69 = tpu.dynamic_rotate %48 by %c511_i32_39 dim 1 : vector<8x512xf32>, i32 -> vector<8x512xf32>
    %c5_40 = arith.constant 5 : index
    %c0_41 = arith.constant 0 : index
    %c0_42 = arith.constant 0 : index
    %70 = vector.load %arg2[%c5_40, %c0_41, %c0_42] : memref<9x1x512xf32, #tpu.memory_space<vmem>>, vector<1x1x512xf32>
    %71 = vector.shape_cast %70 : vector<1x1x512xf32> to vector<1x512xf32>
    %72 = vector.broadcast %71 : vector<1x512xf32> to vector<8x512xf32>
    %73 = arith.mulf %69, %72 : vector<8x512xf32>
    %c497_i32_43 = arith.constant 497 : i32
    %74 = tpu.dynamic_rotate %48 by %c497_i32_43 dim 1 : vector<8x512xf32>, i32 -> vector<8x512xf32>
    %c6_44 = arith.constant 6 : index
    %c0_45 = arith.constant 0 : index
    %c0_46 = arith.constant 0 : index
    %75 = vector.load %arg2[%c6_44, %c0_45, %c0_46] : memref<9x1x512xf32, #tpu.memory_space<vmem>>, vector<1x1x512xf32>
    %76 = vector.shape_cast %75 : vector<1x1x512xf32> to vector<1x512xf32>
    %77 = vector.broadcast %76 : vector<1x512xf32> to vector<8x512xf32>
    %78 = arith.mulf %74, %77 : vector<8x512xf32>
    %c496_i32_47 = arith.constant 496 : i32
    %79 = tpu.dynamic_rotate %48 by %c496_i32_47 dim 1 : vector<8x512xf32>, i32 -> vector<8x512xf32>
    %c7_48 = arith.constant 7 : index
    %c0_49 = arith.constant 0 : index
    %c0_50 = arith.constant 0 : index
    %80 = vector.load %arg2[%c7_48, %c0_49, %c0_50] : memref<9x1x512xf32, #tpu.memory_space<vmem>>, vector<1x1x512xf32>
    %81 = vector.shape_cast %80 : vector<1x1x512xf32> to vector<1x512xf32>
    %82 = vector.broadcast %81 : vector<1x512xf32> to vector<8x512xf32>
    %83 = arith.mulf %79, %82 : vector<8x512xf32>
    %c495_i32_51 = arith.constant 495 : i32
    %84 = tpu.dynamic_rotate %48 by %c495_i32_51 dim 1 : vector<8x512xf32>, i32 -> vector<8x512xf32>
    %c8_52 = arith.constant 8 : index
    %c0_53 = arith.constant 0 : index
    %c0_54 = arith.constant 0 : index
    %85 = vector.load %arg2[%c8_52, %c0_53, %c0_54] : memref<9x1x512xf32, #tpu.memory_space<vmem>>, vector<1x1x512xf32>
    %86 = vector.shape_cast %85 : vector<1x1x512xf32> to vector<1x512xf32>
    %87 = vector.broadcast %86 : vector<1x512xf32> to vector<8x512xf32>
    %88 = arith.mulf %84, %87 : vector<8x512xf32>
    %89 = tpu.concatenate %53, %58, %63, %68, %48, %73, %78, %83, %88 in 0 : vector<8x512xf32>, vector<8x512xf32>, vector<8x512xf32>, vector<8x512xf32>, vector<8x512xf32>, vector<8x512xf32>, vector<8x512xf32>, vector<8x512xf32>, vector<8x512xf32> -> vector<72x512xf32>
    %c0_55 = arith.constant 0 : index
    %c0_56 = arith.constant 0 : index
    %90 = vector.load %arg5[%c0_55, %c0_56] : memref<16x72xf32, #tpu.memory_space<vmem>>, vector<16x72xf32>
    %cst_57 = arith.constant dense<0.000000e+00> : vector<16x512xf32>
    %91 = tpu.matmul %90, %89, %cst_57 {dimension_numbers = #tpu.dot_dimension_numbers<[1], [0], [0], [1], [0, 0, 1, 1], [], []>} : vector<16x72xf32>, vector<72x512xf32>, vector<16x512xf32> -> vector<16x512xf32>
    %c0_58 = arith.constant 0 : index
    %c0_59 = arith.constant 0 : index
    %92 = vector.load %arg6[%c0_58, %c0_59] : memref<16x1xf32, #tpu.memory_space<vmem>>, vector<16x1xf32>
    %93 = vector.broadcast %92 : vector<16x1xf32> to vector<16x512xf32>
    %94 = arith.addf %91, %93 : vector<16x512xf32>
    %cst_60 = arith.constant 0.000000e+00 : f32
    %95 = vector.broadcast %cst_60 : f32 to vector<16x512xf32>
    %96 = arith.maximumf %94, %95 : vector<16x512xf32>
    %c17_i32_61 = arith.constant 17 : i32
    %97 = tpu.dynamic_rotate %96 by %c17_i32_61 dim 1 : vector<16x512xf32>, i32 -> vector<16x512xf32>
    %c0_62 = arith.constant 0 : index
    %c0_63 = arith.constant 0 : index
    %c0_64 = arith.constant 0 : index
    %98 = vector.load %arg2[%c0_62, %c0_63, %c0_64] : memref<9x1x512xf32, #tpu.memory_space<vmem>>, vector<1x1x512xf32>
    %99 = vector.shape_cast %98 : vector<1x1x512xf32> to vector<1x512xf32>
    %100 = vector.broadcast %99 : vector<1x512xf32> to vector<16x512xf32>
    %101 = arith.mulf %97, %100 : vector<16x512xf32>
    %c16_i32_65 = arith.constant 16 : i32
    %102 = tpu.dynamic_rotate %96 by %c16_i32_65 dim 1 : vector<16x512xf32>, i32 -> vector<16x512xf32>
    %c1_66 = arith.constant 1 : index
    %c0_67 = arith.constant 0 : index
    %c0_68 = arith.constant 0 : index
    %103 = vector.load %arg2[%c1_66, %c0_67, %c0_68] : memref<9x1x512xf32, #tpu.memory_space<vmem>>, vector<1x1x512xf32>
    %104 = vector.shape_cast %103 : vector<1x1x512xf32> to vector<1x512xf32>
    %105 = vector.broadcast %104 : vector<1x512xf32> to vector<16x512xf32>
    %106 = arith.mulf %102, %105 : vector<16x512xf32>
    %c15_i32_69 = arith.constant 15 : i32
    %107 = tpu.dynamic_rotate %96 by %c15_i32_69 dim 1 : vector<16x512xf32>, i32 -> vector<16x512xf32>
    %c2_70 = arith.constant 2 : index
    %c0_71 = arith.constant 0 : index
    %c0_72 = arith.constant 0 : index
    %108 = vector.load %arg2[%c2_70, %c0_71, %c0_72] : memref<9x1x512xf32, #tpu.memory_space<vmem>>, vector<1x1x512xf32>
    %109 = vector.shape_cast %108 : vector<1x1x512xf32> to vector<1x512xf32>
    %110 = vector.broadcast %109 : vector<1x512xf32> to vector<16x512xf32>
    %111 = arith.mulf %107, %110 : vector<16x512xf32>
    %c1_i32_73 = arith.constant 1 : i32
    %112 = tpu.dynamic_rotate %96 by %c1_i32_73 dim 1 : vector<16x512xf32>, i32 -> vector<16x512xf32>
    %c3_74 = arith.constant 3 : index
    %c0_75 = arith.constant 0 : index
    %c0_76 = arith.constant 0 : index
    %113 = vector.load %arg2[%c3_74, %c0_75, %c0_76] : memref<9x1x512xf32, #tpu.memory_space<vmem>>, vector<1x1x512xf32>
    %114 = vector.shape_cast %113 : vector<1x1x512xf32> to vector<1x512xf32>
    %115 = vector.broadcast %114 : vector<1x512xf32> to vector<16x512xf32>
    %116 = arith.mulf %112, %115 : vector<16x512xf32>
    %c511_i32_77 = arith.constant 511 : i32
    %117 = tpu.dynamic_rotate %96 by %c511_i32_77 dim 1 : vector<16x512xf32>, i32 -> vector<16x512xf32>
    %c5_78 = arith.constant 5 : index
    %c0_79 = arith.constant 0 : index
    %c0_80 = arith.constant 0 : index
    %118 = vector.load %arg2[%c5_78, %c0_79, %c0_80] : memref<9x1x512xf32, #tpu.memory_space<vmem>>, vector<1x1x512xf32>
    %119 = vector.shape_cast %118 : vector<1x1x512xf32> to vector<1x512xf32>
    %120 = vector.broadcast %119 : vector<1x512xf32> to vector<16x512xf32>
    %121 = arith.mulf %117, %120 : vector<16x512xf32>
    %c497_i32_81 = arith.constant 497 : i32
    %122 = tpu.dynamic_rotate %96 by %c497_i32_81 dim 1 : vector<16x512xf32>, i32 -> vector<16x512xf32>
    %c6_82 = arith.constant 6 : index
    %c0_83 = arith.constant 0 : index
    %c0_84 = arith.constant 0 : index
    %123 = vector.load %arg2[%c6_82, %c0_83, %c0_84] : memref<9x1x512xf32, #tpu.memory_space<vmem>>, vector<1x1x512xf32>
    %124 = vector.shape_cast %123 : vector<1x1x512xf32> to vector<1x512xf32>
    %125 = vector.broadcast %124 : vector<1x512xf32> to vector<16x512xf32>
    %126 = arith.mulf %122, %125 : vector<16x512xf32>
    %c496_i32_85 = arith.constant 496 : i32
    %127 = tpu.dynamic_rotate %96 by %c496_i32_85 dim 1 : vector<16x512xf32>, i32 -> vector<16x512xf32>
    %c7_86 = arith.constant 7 : index
    %c0_87 = arith.constant 0 : index
    %c0_88 = arith.constant 0 : index
    %128 = vector.load %arg2[%c7_86, %c0_87, %c0_88] : memref<9x1x512xf32, #tpu.memory_space<vmem>>, vector<1x1x512xf32>
    %129 = vector.shape_cast %128 : vector<1x1x512xf32> to vector<1x512xf32>
    %130 = vector.broadcast %129 : vector<1x512xf32> to vector<16x512xf32>
    %131 = arith.mulf %127, %130 : vector<16x512xf32>
    %c495_i32_89 = arith.constant 495 : i32
    %132 = tpu.dynamic_rotate %96 by %c495_i32_89 dim 1 : vector<16x512xf32>, i32 -> vector<16x512xf32>
    %c8_90 = arith.constant 8 : index
    %c0_91 = arith.constant 0 : index
    %c0_92 = arith.constant 0 : index
    %133 = vector.load %arg2[%c8_90, %c0_91, %c0_92] : memref<9x1x512xf32, #tpu.memory_space<vmem>>, vector<1x1x512xf32>
    %134 = vector.shape_cast %133 : vector<1x1x512xf32> to vector<1x512xf32>
    %135 = vector.broadcast %134 : vector<1x512xf32> to vector<16x512xf32>
    %136 = arith.mulf %132, %135 : vector<16x512xf32>
    %137 = tpu.concatenate %101, %106, %111, %116, %96, %121, %126, %131, %136 in 0 : vector<16x512xf32>, vector<16x512xf32>, vector<16x512xf32>, vector<16x512xf32>, vector<16x512xf32>, vector<16x512xf32>, vector<16x512xf32>, vector<16x512xf32>, vector<16x512xf32> -> vector<144x512xf32>
    %c0_93 = arith.constant 0 : index
    %c0_94 = arith.constant 0 : index
    %138 = vector.load %arg7[%c0_93, %c0_94] : memref<16x144xf32, #tpu.memory_space<vmem>>, vector<16x144xf32>
    %cst_95 = arith.constant dense<0.000000e+00> : vector<16x512xf32>
    %139 = tpu.matmul %138, %137, %cst_95 {dimension_numbers = #tpu.dot_dimension_numbers<[1], [0], [0], [1], [0, 0, 1, 1], [], []>} : vector<16x144xf32>, vector<144x512xf32>, vector<16x512xf32> -> vector<16x512xf32>
    %c0_96 = arith.constant 0 : index
    %c0_97 = arith.constant 0 : index
    %140 = vector.load %arg8[%c0_96, %c0_97] : memref<16x1xf32, #tpu.memory_space<vmem>>, vector<16x1xf32>
    %141 = vector.broadcast %140 : vector<16x1xf32> to vector<16x512xf32>
    %142 = arith.addf %139, %141 : vector<16x512xf32>
    %c0_98 = arith.constant 0 : index
    %c0_99 = arith.constant 0 : index
    %143 = vector.load %arg9[%c0_98, %c0_99] : memref<16x512xf32, #tpu.memory_space<vmem>>, vector<16x512xf32>
    tpu.vector_store %arg9[%c0_98, %c0_99], %142 {strides = array<i32>} : memref<16x512xf32, #tpu.memory_space<vmem>>, vector<16x512xf32>,
    return
  }
  func.func @transform_0(%arg0: i32) -> (i32, i32) {
    %c0_i32 = arith.constant 0 : i32
    %c0_i32_0 = arith.constant 0 : i32
    return %c0_i32, %arg0 : i32, i32
  }
  func.func @transform_1(%arg0: i32) -> (i32, i32, i32) {
    %c0_i32 = arith.constant 0 : i32
    %c0_i32_0 = arith.constant 0 : i32
    %c0_i32_1 = arith.constant 0 : i32
    %c0_i32_2 = arith.constant 0 : i32
    return %c0_i32, %c0_i32_0, %c0_i32_1 : i32, i32, i32
  }
  func.func @transform_2(%arg0: i32) -> (i32, i32) {
    %c0_i32 = arith.constant 0 : i32
    %c0_i32_0 = arith.constant 0 : i32
    %c0_i32_1 = arith.constant 0 : i32
    return %c0_i32, %c0_i32_0 : i32, i32
  }
  func.func @transform_3(%arg0: i32) -> (i32, i32) {
    %c0_i32 = arith.constant 0 : i32
    %c0_i32_0 = arith.constant 0 : i32
    %c0_i32_1 = arith.constant 0 : i32
    return %c0_i32, %c0_i32_0 : i32, i32
  }
  func.func @transform_4(%arg0: i32) -> (i32, i32) {
    %c0_i32 = arith.constant 0 : i32
    %c0_i32_0 = arith.constant 0 : i32
    %c0_i32_1 = arith.constant 0 : i32
    return %c0_i32, %c0_i32_0 : i32, i32
  }
  func.func @transform_5(%arg0: i32) -> (i32, i32) {
    %c0_i32 = arith.constant 0 : i32
    %c0_i32_0 = arith.constant 0 : i32
    %c0_i32_1 = arith.constant 0 : i32
    return %c0_i32, %c0_i32_0 : i32, i32
  }
  func.func @transform_6(%arg0: i32) -> (i32, i32) {
    %c0_i32 = arith.constant 0 : i32
    %c0_i32_0 = arith.constant 0 : i32
    %c0_i32_1 = arith.constant 0 : i32
    return %c0_i32, %c0_i32_0 : i32, i32
  }
  func.func @transform_7(%arg0: i32) -> (i32, i32) {
    %c0_i32 = arith.constant 0 : i32
    %c0_i32_0 = arith.constant 0 : i32
    %c0_i32_1 = arith.constant 0 : i32
    return %c0_i32, %c0_i32_0 : i32, i32
  }
  func.func @transform_8(%arg0: i32) -> (i32, i32) {
    %c0_i32 = arith.constant 0 : i32
    %c0_i32_0 = arith.constant 0 : i32
    return %c0_i32, %arg0 : i32, i32
  }
}

</mosaic_0001>

<bundles_post_ra>
// kernel: _lambda_.1
= control target key start
LH: loop header
LB: loop body
LE: loop exit
PB: predicated region body
PF: predicated region fallthrough
CT: control target
= control target key end

     0   :  { %s1431_s9 = smov 17   ;;  %s1432_s14 = smov 16   ;;  %v1438_v4 = vmov 0.0   ;;  %v1439_v5 = vmov 0   ;;  %v41_v7 = vlaneseq  ;;  %vm361_vm8 = vcmask 588800   ;;  %s2522_s0 = inlined_call_operand.vmem [shape: f32[8,512], index: 0, kind: input, shape index: {}]   ;;  %s2523_s3 = inlined_call_operand.vmem [shape: f32[8,1], index: 3, kind: input, shape index: {}]   ;;  %s2524_s1 = inlined_call_operand.vmem [shape: f32[9,1,512], index: 1, kind: input, shape index: {}]   ;;  %s2525_s2 = inlined_call_operand.vmem [shape: f32[8,72], index: 2, kind: input, shape index: {}]   ;;  %s2526_s5 = inlined_call_operand.vmem [shape: f32[16,1], index: 5, kind: input, shape index: {}]   ;;  %s2527_s4 = inlined_call_operand.vmem [shape: f32[16,72], index: 4, kind: input, shape index: {}]   ;;  %s2528_s6 = inlined_call_operand.vmem [shape: f32[16,144], index: 6, kind: input, shape index: {}]   ;;  %s2529_s7 = inlined_call_operand.vmem [shape: f32[16,1], index: 7, kind: input, shape index: {}]   ;;  %s2530_s8 = inlined_call_operand.vmem [shape: f32[16,512], index: 8, kind: output, shape index: {}]  }
   0x1   :  { %v1489_v0 = vld [vmem:[%s2522_s0 + $0x10] sm:$0xff]  ;;  %v1494_v1 = vld [vmem:[%s2522_s0] sm:$0xff]  ;;  %v1503_v2 = vld [vmem:[%s2522_s0 + $0x18] sm:$0xff]  ;;  %s1434_s15 = smov 1   ;;  %s1435_s16 = smov 127   ;;  %429 = vmatprep.mubr.f32.mxu0 %v1438_v4  ;;  %500 = vmatprep.mubr.f32.mxu1 %v1438_v4  ;;  %vm1093_vm9 = vcmask 130048  }
   0x2   :  { %37 = vrot.lane.b32.xlu1 %v1489_v0, %s1431_s9  ;;  %33 = vrot.lane.b32.xlu0 %v1494_v1, %s1431_s9  ;;  %v1508_v3 = vld [vmem:[%s2522_s0 + $0x8] sm:$0xff]  ;;  %s1433_s0 = smov 15   ;;  %s1436_s17 = smov 113   ;;  %v355_v6 = vld [vmem:[%s2523_s3] sm:$0xff]  ;;  %v51_v8 = vshrl.u32 %v41_v7, 7  ;;  %v1575_v11 = vand.u32 127, %v41_v7 }
   0x3   :  { %s1437_s18 = smov 112   ;;  %1429 = vset.pattern.permute.xlu0 %v1439_v5  ;;  %1430 = vset.pattern.permute.xlu1 %v1439_v5  ;;  %s1440_s19 = smov 111   ;;  %v48_v13 = vld [vmem:[%s2524_s1] sm:$0xf]  ;;  %v1266_v14 = vld [vmem:[%s2524_s1 + $0x4] sm:$0xf] }
   0x4   :  { %v1577_v12 = vsub.s32 1, %v51_v8  ;;  %vm43_vm0 = vcmp.lt.s32.totalorder %v1575_v11, 17  ;;  %v1586_v17 = vsub.s32 0, %v51_v8  ;;  %v1588_v18 = vsub.s32 3, %v51_v8  ;;  %v1267_v54 = vld [vmem:[%s2524_s1 + $0x8] sm:$0xf] }
   0x5   :  { %v1590_v19 = vsub.s32 2, %v51_v8  ;;  %vm82_vm1 = vcmp.lt.s32.totalorder %v1575_v11, 16  ;;  %v1268_v55 = vld [vmem:[%s2524_s1 + $0xc] sm:$0xf]  ;;  %vm122_vm2 = vcmp.lt.s32.totalorder %v1575_v11, 15  ;;  %vm162_vm3 = vcmp.lt.s32.totalorder %v1575_v11, 1 }
   0x6   :  { %39 = vrot.lane.b32.xlu1 %v1503_v2, %s1431_s9  ;;  %35 = vrot.lane.b32.xlu0 %v1508_v3, %s1431_s9  ;;  %v1594_v20 = vrot.slane %v48_v13, %v1577_v12  ;;  %v1597_v21 = vrot.slane %v1266_v14, %v1577_v12  ;;  %v1602_v25 = vrot.slane %v48_v13, %v1586_v17  ;;  %vm202_vm4 = vcmp.lt.s32.totalorder %v1575_v11, 127 }
   0x7   :  { %v1605_v26 = vrot.slane %v1266_v14, %v1586_v17  ;;  %v1608_v27 = vrot.slane %v48_v13, %v1588_v18  ;;  %v1615_v30 = vrot.slane %v1266_v14, %v1588_v18  ;;  %v1618_v31 = vrot.slane %v48_v13, %v1590_v19 }
   0x8   :  { %v1625_v35 = vrot.slane %v1266_v14, %v1590_v19  ;;  %v1649_v58 = vrot.slane %v1267_v54, %v1577_v12  ;;  %v1653_v59 = vrot.slane %v1268_v55, %v1577_v12  ;;  %v1658_v61 = vrot.slane %v1267_v54, %v1586_v17 }
   0x9   :  { %v1661_v62 = vrot.slane %v1267_v54, %v1590_v19  ;;  %v1664_v63 = vrot.slane %v1267_v54, %v1588_v18  ;;  %vm282_vm5 = vcmp.lt.s32.totalorder %v1575_v11, 112  ;;  %vm242_vm6 = vcmp.lt.s32.totalorder %v1575_v11, 113 }
   0xa   :  { %76 = vrot.lane.b32.xlu1 %v1508_v3, %s1432_s14  ;;  %74 = vrot.lane.b32.xlu0 %v1494_v1, %s1432_s14  ;;  %vm322_vm7 = vcmp.lt.s32.totalorder %v1575_v11, 111  ;;  %v1080_v11 = vld [vmem:[%s2528_s6 + $0x18] sm:$0xff] }
   0xe   :  { %80 = vrot.lane.b32.xlu1 %v1503_v2, %s1432_s14  ;;  %78 = vrot.lane.b32.xlu0 %v1489_v0, %s1432_s14 }
  0x12   :  { %116 = vrot.lane.b32.xlu1 %v1508_v3, %s1433_s0  ;;  %114 = vrot.lane.b32.xlu0 %v1494_v1, %s1433_s0 }
  0x16   :  { %120 = vrot.lane.b32.xlu1 %v1503_v2, %s1433_s0  ;;  %118 = vrot.lane.b32.xlu0 %v1489_v0, %s1433_s0 }
  0x1a   :  { %156 = vrot.lane.b32.xlu1 %v1508_v3, %s1434_s15  ;;  %154 = vrot.lane.b32.xlu0 %v1494_v1, %s1434_s15 }
  0x1e   :  { %160 = vrot.lane.b32.xlu1 %v1503_v2, %s1434_s15  ;;  %158 = vrot.lane.b32.xlu0 %v1489_v0, %s1434_s15 }
  0x22   :  { %196 = vrot.lane.b32.xlu1 %v1508_v3, %s1435_s16  ;;  %194 = vrot.lane.b32.xlu0 %v1494_v1, %s1435_s16 }
  0x26   :  { %200 = vrot.lane.b32.xlu1 %v1503_v2, %s1435_s16  ;;  %198 = vrot.lane.b32.xlu0 %v1489_v0, %s1435_s16 }
  0x2a   :  { %236 = vrot.lane.b32.xlu1 %v1508_v3, %s1436_s17  ;;  %234 = vrot.lane.b32.xlu0 %v1494_v1, %s1436_s17 }
  0x2e   :  { %240 = vrot.lane.b32.xlu1 %v1503_v2, %s1436_s17  ;;  %238 = vrot.lane.b32.xlu0 %v1489_v0, %s1436_s17 }
  0x32   :  { %276 = vrot.lane.b32.xlu1 %v1508_v3, %s1437_s18  ;;  %274 = vrot.lane.b32.xlu0 %v1494_v1, %s1437_s18 }
  0x36   :  { %280 = vrot.lane.b32.xlu1 %v1503_v2, %s1437_s18  ;;  %278 = vrot.lane.b32.xlu0 %v1489_v0, %s1437_s18 }
  0x3a   :  { %316 = vrot.lane.b32.xlu1 %v1508_v3, %s1440_s19  ;;  %314 = vrot.lane.b32.xlu0 %v1494_v1, %s1440_s19 }
  0x3e   :  { %320 = vrot.lane.b32.xlu1 %v1503_v2, %s1440_s19  ;;  %318 = vrot.lane.b32.xlu0 %v1489_v0, %s1440_s19 }
  0x42   :  { %358 = vperm.xlu0 %1429, %v355_v6  }
  0x74   :  { %v38_v9 = vpop.permute.xlu1 %37  ;;  %v34_v10 = vpop.permute.xlu0 %33 }
  0x78   :  { %v40_v15 = vpop.permute.xlu1 %39  ;;  %v36_v16 = vpop.permute.xlu0 %35 }
  0x79   :  { %v46_v22 = vsel %vm43_vm0, %v34_v10, %v36_v16  ;;  %v47_v28 = vsel %vm43_vm0, %v40_v15, %v34_v10  ;;  %v44_v34 = vsel %vm43_vm0, %v38_v9, %v40_v15  ;;  %v45_v36 = vsel %vm43_vm0, %v36_v16, %v38_v9 }
  0x7a   :  { %v71_v32 = vmul.f32 %v1594_v20, %v46_v22  ;;  %v70_v40 = vmul.f32 %v1602_v25, %v47_v28  ;;  %v73_v43 = vmul.f32 %v1608_v27, %v44_v34  ;;  %v72_v47 = vmul.f32 %v1618_v31, %v45_v36 }
  0x7b   :  { %v1671_v9 = vrot.slane %v1268_v55, %v1586_v17  ;;  %v1674_v10 = vrot.slane %v1268_v55, %v1590_v19  ;;  %v1681_v16 = vrot.slane %v1268_v55, %v1588_v18 }
  0x7c   :  { %v77_v23 = vpop.permute.xlu1 %76  ;;  %v75_v24 = vpop.permute.xlu0 %74 }
  0x7d   :  { %v85_v29 = vsel %vm82_vm1, %v75_v24, %v77_v23 }
  0x7e   :  { %v111_v33 = vmul.f32 %v1597_v21, %v85_v29 }
  0x80   :  { %v81_v37 = vpop.permute.xlu1 %80  ;;  %v79_v38 = vpop.permute.xlu0 %78  ;;  %v1283_v39 = vpack.c.bf16 %v111_v33, %v71_v32 }
  0x81   :  { %v86_v41 = vsel %vm82_vm1, %v81_v37, %v75_v24  ;;  %v84_v42 = vsel %vm82_vm1, %v77_v23, %v79_v38  ;;  %v83_v44 = vsel %vm82_vm1, %v79_v38, %v81_v37 }
  0x82   :  { %1284 = vmatprep.subr.bf16.mxu0 %v1283_v39  ;;  %v110_v45 = vmul.f32 %v1605_v26, %v86_v41  ;;  %v113_v46 = vmul.f32 %v1615_v30, %v83_v44  ;;  %v112_v48 = vmul.f32 %v1625_v35, %v84_v42  ;;  %v1269_v41 = vld [vmem:[%s2524_s1 + $0x14] sm:$0xf] }
  0x84   :  { %v117_v49 = vpop.permute.xlu1 %116  ;;  %v115_v50 = vpop.permute.xlu0 %114  ;;  %v1285_v51 = vpack.c.bf16 %v110_v45, %v70_v40  ;;  %v1299_v52 = vpack.c.bf16 %v113_v46, %v73_v43  ;;  %v1301_v53 = vpack.c.bf16 %v112_v48, %v72_v47  ;;  %v1702_v47 = vrot.slane %v1269_v41, %v1586_v17 }
  0x85   :  { %v125_v60 = vsel %vm122_vm2, %v115_v50, %v117_v49  ;;  %v1705_v48 = vrot.slane %v1269_v41, %v1588_v18 }
  0x86   :  { %1286 = vmatpush1.bf16.msra.mxu0 %v1285_v51  ;;  %1300 = vmatprep.subr.bf16.mxu1 %v1299_v52  ;;  %v151_v13 = vmul.f32 %v1649_v58, %v125_v60  ;;  %v1713_v51 = vrot.slane %v1269_v41, %v1590_v19 }
  0x87   :  { %1302 = vmatpush1.bf16.msra.mxu1 %v1301_v53 }
  0x88   :  { %v121_v56 = vpop.permute.xlu1 %120  ;;  %v119_v57 = vpop.permute.xlu0 %118 }
  0x89   :  { %v126_v7 = vsel %vm122_vm2, %v121_v56, %v115_v50  ;;  %v124_v14 = vsel %vm122_vm2, %v117_v49, %v119_v57  ;;  %v123_v22 = vsel %vm122_vm2, %v119_v57, %v121_v56  ;;  %v1710_v50 = vrot.slane %v1269_v41, %v1577_v12 }
  0x8a   :  { %v150_v23 = vmul.f32 %v1658_v61, %v126_v7  ;;  %v152_v32 = vmul.f32 %v1661_v62, %v124_v14  ;;  %v153_v37 = vmul.f32 %v1664_v63, %v123_v22 }
  0x8c   :  { %v157_v5 = vpop.permute.xlu1 %156  ;;  %v155_v6 = vpop.permute.xlu0 %154 }
  0x8d   :  { %v165_v8 = vsel %vm162_vm3, %v155_v6, %v157_v5 }
  0x8e   :  { %v191_v15 = vmul.f32 %v1653_v59, %v165_v8 }
  0x90   :  { %v161_v24 = vpop.permute.xlu1 %160  ;;  %v159_v28 = vpop.permute.xlu0 %158  ;;  %v1287_v29 = vpack.c.bf16 %v191_v15, %v151_v13 }
  0x91   :  { %v166_v33 = vsel %vm162_vm3, %v161_v24, %v155_v6  ;;  %v163_v34 = vsel %vm162_vm3, %v159_v28, %v161_v24  ;;  %v164_v36 = vsel %vm162_vm3, %v157_v5, %v159_v28  ;;  %v1271_v28 = vld [vmem:[%s2524_s1 + $0x1c] sm:$0xf] }
  0x92   :  { %v190_v38 = vmul.f32 %v1671_v9, %v166_v33  ;;  %v192_v39 = vmul.f32 %v1674_v10, %v164_v36  ;;  %v193_v40 = vmul.f32 %v1681_v16, %v163_v34  ;;  %1288 = vmatprep.subr.bf16.mxu0 %v1287_v29  ;;  %v1751_v36 = vrot.slane %v1271_v28, %v1586_v17 }
  0x94   :  { %v197_v42 = vpop.permute.xlu1 %196  ;;  %v195_v43 = vpop.permute.xlu0 %194  ;;  %v1289_v44 = vpack.c.bf16 %v190_v38, %v150_v23  ;;  %v1303_v45 = vpack.c.bf16 %v193_v40, %v153_v37  ;;  %v1305_v46 = vpack.c.bf16 %v192_v39, %v152_v32  ;;  %2571 = vst [vmem:[#allocation5_spill] sm:$0xff] %v1751_v36  ;;  %v1756_v38 = vrot.slane %v1271_v28, %v1588_v18 }
  0x95   :  { %v205_v49 = vsel %vm202_vm4, %v195_v43, %v197_v42  ;;  %v1759_v39 = vrot.slane %v1271_v28, %v1577_v12  ;;  %v1762_v40 = vrot.slane %v1271_v28, %v1590_v19 }
  0x96   :  { %1290 = vmatpush1.bf16.msra.mxu0 %v1289_v44  ;;  %1304 = vmatprep.subr.bf16.mxu1 %v1303_v45  ;;  %v230_v54 = vmul.f32 %v1702_v47, %v205_v49  ;;  %2572 = vst [vmem:[#allocation6_spill] sm:$0xff] %v1756_v38 }
  0x97   :  { %1306 = vmatpush1.bf16.msra.mxu1 %v1305_v46  ;;  %2573 = vst [vmem:[#allocation7_spill] sm:$0xff] %v1759_v39  ;;  %2574 = vst [vmem:[#allocation8_spill] sm:$0xff] %v1762_v40 }
  0x98   :  { %v201_v52 = vpop.permute.xlu1 %200  ;;  %v199_v53 = vpop.permute.xlu0 %198  ;;  %v1293_v22 = vpack.c.bf16 %v230_v54, %v1494_v1 }
  0x99   :  { %v206_v55 = vsel %vm202_vm4, %v201_v52, %v195_v43  ;;  %v203_v56 = vsel %vm202_vm4, %v199_v53, %v201_v52  ;;  %v204_v57 = vsel %vm202_vm4, %v197_v42, %v199_v53 }
  0x9a   :  { %v233_v60 = vmul.f32 %v1705_v48, %v206_v55  ;;  %v231_v5 = vmul.f32 %v1710_v50, %v204_v57  ;;  %v232_v6 = vmul.f32 %v1713_v51, %v203_v56 }
  0x9c   :  { %v237_v7 = vpop.permute.xlu1 %236  ;;  %v235_v8 = vpop.permute.xlu0 %234  ;;  %v1291_v13 = vpack.c.bf16 %v231_v5, %v1508_v3  ;;  %v1307_v14 = vpack.c.bf16 %v233_v60, %v1503_v2  ;;  %v1309_v15 = vpack.c.bf16 %v232_v6, %v1489_v0  ;;  %v1270_v3 = vld [vmem:[%s2524_s1 + $0x18] sm:$0xf] }
  0x9d   :  { %v1738_v0 = vrot.slane %v1270_v3, %v1588_v18  ;;  %v1741_v1 = vrot.slane %v1270_v3, %v1577_v12  ;;  %v1746_v33 = vrot.slane %v1270_v3, %v1590_v19  ;;  %v1765_v41 = vrot.slane %v1270_v3, %v1586_v17 }
  0x9e   :  { %1292 = vmatprep.subr.bf16.mxu0 %v1291_v13  ;;  %1308 = vmatprep.subr.bf16.mxu1 %v1307_v14  ;;  %v245_v43 = vsel %vm242_vm6, %v235_v8, %v237_v7 }
  0x9f   :  { %1294 = vmatpush1.bf16.msra.mxu0 %v1293_v22  ;;  %1310 = vmatpush1.bf16.msra.mxu1 %v1309_v15  ;;  %2568 = vst [vmem:[#allocation2_spill] sm:$0xff] %v1738_v0  ;;  %2569 = vst [vmem:[#allocation3_spill] sm:$0xff] %v1741_v1  ;;  %v270_v6 = vmul.f32 %v1765_v41, %v245_v43  ;;  %v1272_v22 = vld [vmem:[%s2524_s1 + $0x20] sm:$0xf] }
  0xa0   :  { %v241_v23 = vpop.permute.xlu1 %240  ;;  %v239_v24 = vpop.permute.xlu0 %238  ;;  %2570 = vst [vmem:[#allocation4_spill] sm:$0xff] %v1746_v33  ;;  %2575 = vst [vmem:[#allocation9_spill] sm:$0xff] %v1765_v41  ;;  %v1793_v28 = vrot.slane %v1272_v22, %v1588_v18  ;;  %v1796_v3 = vrot.slane %v1272_v22, %v1590_v19 }
  0xa1   :  { %v246_v32 = vsel %vm242_vm6, %v241_v23, %v235_v8  ;;  %v244_v34 = vsel %vm242_vm6, %v237_v7, %v239_v24  ;;  %v243_v42 = vsel %vm242_vm6, %v239_v24, %v241_v23  ;;  %v1790_v24 = vrot.slane %v1272_v22, %v1577_v12 }
  0xa2   :  { %v273_v44 = vmul.f32 %v1738_v0, %v246_v32  ;;  %v271_v45 = vmul.f32 %v1741_v1, %v244_v34  ;;  %v272_v56 = vmul.f32 %v1746_v33, %v243_v42  ;;  %2577 = vst [vmem:[#allocation11_spill] sm:$0xff] %v1793_v28  ;;  %2578 = vst [vmem:[#allocation12_spill] sm:$0xff] %v1796_v3 }
  0xa3   :  { %2576 = vst [vmem:[#allocation10_spill] sm:$0xff] %v1790_v24 }
  0xa4   :  { %v277_v2 = vpop.permute.xlu1 %276  ;;  %v275_v29 = vpop.permute.xlu0 %274 }
  0xa5   :  { %v285_v37 = vsel %vm282_vm5, %v275_v29, %v277_v2 }
  0xa6   :  { %v310_v52 = vmul.f32 %v1751_v36, %v285_v37 }
  0xa8   :  { %v281_v46 = vpop.permute.xlu1 %280  ;;  %v279_v49 = vpop.permute.xlu0 %278  ;;  %v1297_v23 = vpack.c.bf16 %v310_v52, %v270_v6 }
  0xa9   :  { %v286_v53 = vsel %vm282_vm5, %v281_v46, %v275_v29  ;;  %v283_v54 = vsel %vm282_vm5, %v279_v49, %v281_v46  ;;  %v284_v55 = vsel %vm282_vm5, %v277_v2, %v279_v49  ;;  %v1799_v2 = vrot.slane %v1272_v22, %v1586_v17 }
  0xaa   :  { %v313_v57 = vmul.f32 %v1756_v38, %v286_v53  ;;  %v311_v60 = vmul.f32 %v1759_v39, %v284_v55  ;;  %v312_v5 = vmul.f32 %v1762_v40, %v283_v54 }
  0xab   :  { %2579 = vst [vmem:[#allocation13_spill] sm:$0xff] %v1799_v2 }
  0xac   :  { %v317_v7 = vpop.permute.xlu1 %316  ;;  %v315_v8 = vpop.permute.xlu0 %314  ;;  %v1295_v13 = vpack.c.bf16 %v311_v60, %v271_v45  ;;  %v1311_v14 = vpack.c.bf16 %v313_v57, %v273_v44  ;;  %v1313_v15 = vpack.c.bf16 %v312_v5, %v272_v56  ;;  %v354_v44 = vld [vmem:[%s2525_s2] sm:$0xff] }
  0xad   :  { %v325_v29 = vsel %vm322_vm7, %v315_v8, %v317_v7 }
  0xae   :  { %1296 = vmatprep.subr.bf16.mxu0 %v1295_v13  ;;  %1312 = vmatprep.subr.bf16.mxu1 %v1311_v14  ;;  %v350_v43 = vmul.f32 %v1799_v2, %v325_v29  ;;  %v642_v13 = vld [vmem:[%s2526_s5 + $0x8] sm:$0xff] }
  0xaf   :  { %1298 = vmatpush1.bf16.msra.mxu0 %v1297_v23  ;;  %1314 = vmatpush1.bf16.msra.mxu1 %v1313_v15 }
  0xb0   :  { %v321_v32 = vpop.permute.xlu1 %320  ;;  %v319_v34 = vpop.permute.xlu0 %318 }
  0xb1   :  { %v326_v12 = vsel %vm322_vm7, %v321_v32, %v315_v8  ;;  %v323_v18 = vsel %vm322_vm7, %v319_v34, %v321_v32  ;;  %v324_v19 = vsel %vm322_vm7, %v317_v7, %v319_v34  ;;  %v641_v8 = vld [vmem:[%s2526_s5] sm:$0xff] }
  0xb2   :  { %v351_v37 = vmul.f32 %v1790_v24, %v324_v19  ;;  %v353_v42 = vmul.f32 %v1793_v28, %v326_v12  ;;  %v352_v17 = vmul.f32 %v1796_v3, %v323_v18 }
  0xb4   :  { %381 = vmatprep.subr.mxu0 %v351_v37  ;;  %452 = vmatprep.subr.mxu1 %v353_v42 }
  0xb5   :  { %382 = vmatpush1.msra.mxu0 %v350_v43  ;;  %453 = vmatpush1.msra.mxu1 %v352_v17 }
  0xb6   :  { %1273 = vmatmul.mubr.msk.f32.vlgmr.msra.gmra.mrb[0].mxu0 %vm361_vm8, %v354_v44  ;;  %1274 = vmatmul.mubr.msk.f32.vlgmr.msra.gmra.mrb[0].mxu1 %vm361_vm8, %v354_v44 }
  0xb7   :  { %723 = vmatprep.mubr.f32.mxu0 %v1438_v4  ;;  %800 = vmatprep.mubr.f32.mxu1 %v1438_v4 }
  0xc1   :  { %v359_v45 = vpop.permute.xlu0 %358 }
 0x189   :  { %v431_v46 = vpop.f32.mrb[0].mxu0  ;;  %v502_v49 = vpop.f32.mrb[0].mxu1 }
 0x18a   :  { %v432_v52 = vadd.f32 %v431_v46, %v359_v45  ;;  %v503_v53 = vadd.f32 %v502_v49, %v359_v45  ;;  %v433_v54 = vpop.f32.mrb[1].mxu0  ;;  %v504_v55 = vpop.f32.mrb[1].mxu1 }
 0x18b   :  { %v434_v60 = vadd.f32 %v433_v54, %v359_v45  ;;  %v505_v6 = vadd.f32 %v504_v55, %v359_v45 }
 0x18c   :  { %v1820_v56 = vmax.f32 %v432_v52, 0.0  ;;  %v1822_v57 = vmax.f32 %v503_v53, 0.0 }
 0x18d   :  { %v1828_v5 = vmax.f32 %v434_v60, 0.0  ;;  %v1834_v7 = vmax.f32 %v505_v6, 0.0 }
 0x18e   :  { %515 = vrot.lane.b32.xlu0 %v1822_v57, %s1431_s9  ;;  %511 = vrot.lane.b32.xlu1 %v1820_v56, %s1431_s9 }
 0x192   :  { %527 = vrot.lane.b32.xlu0 %v1820_v56, %s1432_s14  ;;  %513 = vrot.lane.b32.xlu1 %v1828_v5, %s1431_s9 }
 0x196   :  { %531 = vrot.lane.b32.xlu0 %v1822_v57, %s1432_s14  ;;  %517 = vrot.lane.b32.xlu1 %v1834_v7, %s1431_s9 }
 0x19a   :  { %543 = vrot.lane.b32.xlu0 %v1820_v56, %s1433_s0  ;;  %529 = vrot.lane.b32.xlu1 %v1828_v5, %s1432_s14 }
 0x19e   :  { %547 = vrot.lane.b32.xlu0 %v1822_v57, %s1433_s0  ;;  %533 = vrot.lane.b32.xlu1 %v1834_v7, %s1432_s14 }
 0x1a2   :  { %559 = vrot.lane.b32.xlu0 %v1820_v56, %s1434_s15  ;;  %545 = vrot.lane.b32.xlu1 %v1828_v5, %s1433_s0 }
 0x1a6   :  { %563 = vrot.lane.b32.xlu0 %v1822_v57, %s1434_s15  ;;  %549 = vrot.lane.b32.xlu1 %v1834_v7, %s1433_s0 }
 0x1aa   :  { %575 = vrot.lane.b32.xlu0 %v1820_v56, %s1435_s16  ;;  %561 = vrot.lane.b32.xlu1 %v1828_v5, %s1434_s15 }
 0x1ae   :  { %579 = vrot.lane.b32.xlu0 %v1822_v57, %s1435_s16  ;;  %565 = vrot.lane.b32.xlu1 %v1834_v7, %s1434_s15 }
 0x1b2   :  { %591 = vrot.lane.b32.xlu0 %v1820_v56, %s1436_s17  ;;  %577 = vrot.lane.b32.xlu1 %v1828_v5, %s1435_s16 }
 0x1b6   :  { %595 = vrot.lane.b32.xlu0 %v1822_v57, %s1436_s17  ;;  %581 = vrot.lane.b32.xlu1 %v1834_v7, %s1435_s16 }
 0x1ba   :  { %607 = vrot.lane.b32.xlu0 %v1820_v56, %s1437_s18  ;;  %593 = vrot.lane.b32.xlu1 %v1828_v5, %s1436_s17 }
 0x1be   :  { %611 = vrot.lane.b32.xlu0 %v1822_v57, %s1437_s18  ;;  %597 = vrot.lane.b32.xlu1 %v1834_v7, %s1436_s17 }
 0x1c2   :  { %623 = vrot.lane.b32.xlu0 %v1820_v56, %s1440_s19  ;;  %609 = vrot.lane.b32.xlu1 %v1828_v5, %s1437_s18 }
 0x1c6   :  { %627 = vrot.lane.b32.xlu0 %v1822_v57, %s1440_s19  ;;  %613 = vrot.lane.b32.xlu1 %v1834_v7, %s1437_s18 }
 0x1ca   :  { %645 = vperm.xlu0 %1429, %v641_v8   ;;  %625 = vrot.lane.b32.xlu1 %v1828_v5, %s1440_s19 }
 0x1ce   :  { %629 = vrot.lane.b32.xlu1 %v1834_v7, %s1440_s19 }
 0x1d2   :  { %650 = vperm.xlu1 %1430, %v642_v13  }
 0x200   :  { %v516_v14 = vpop.permute.xlu0 %515  ;;  %v512_v15 = vpop.permute.xlu1 %511 }
 0x204   :  { %v528_v22 = vpop.permute.xlu0 %527  ;;  %v514_v23 = vpop.permute.xlu1 %513 }
 0x205   :  { %v521_v34 = vsel %vm43_vm0, %v512_v15, %v514_v23  ;;  %v520_v45 = vsel %vm43_vm0, %v514_v23, %v516_v14 }
 0x206   :  { %v524_v37 = vmul.f32 %v521_v34, %v1594_v20 }
 0x208   :  { %v532_v29 = vpop.permute.xlu0 %531  ;;  %v518_v32 = vpop.permute.xlu1 %517 }
 0x209   :  { %v519_v43 = vsel %vm43_vm0, %v516_v14, %v518_v32  ;;  %v522_v44 = vsel %vm43_vm0, %v518_v32, %v512_v15  ;;  %v525_v14 = vmul.f32 %v520_v45, %v1618_v31 }
 0x20a   :  { %v523_v60 = vmul.f32 %v522_v44, %v1602_v25  ;;  %v526_v6 = vmul.f32 %v519_v43, %v1608_v27 }
 0x20c   :  { %v544_v12 = vpop.permute.xlu0 %543  ;;  %v530_v18 = vpop.permute.xlu1 %529 }
 0x20d   :  { %v537_v19 = vsel %vm82_vm1, %v528_v22, %v530_v18  ;;  %v536_v42 = vsel %vm82_vm1, %v530_v18, %v532_v29 }
 0x20e   :  { %v540_v17 = vmul.f32 %v537_v19, %v1597_v21  ;;  %v541_v53 = vmul.f32 %v536_v42, %v1625_v35 }
 0x210   :  { %v548_v46 = vpop.permute.xlu0 %547  ;;  %v534_v49 = vpop.permute.xlu1 %533  ;;  %v1315_v52 = vpack.c.bf16 %v540_v17, %v524_v37  ;;  %v1333_v18 = vpack.c.bf16 %v541_v53, %v525_v14 }
 0x211   :  { %v535_v54 = vsel %vm82_vm1, %v532_v29, %v534_v49  ;;  %v538_v55 = vsel %vm82_vm1, %v534_v49, %v528_v22 }
 0x212   :  { %v539_v8 = vmul.f32 %v538_v55, %v1605_v26  ;;  %v542_v13 = vmul.f32 %v535_v54, %v1615_v30  ;;  %1316 = vmatprep.subr.bf16.mxu0 %v1315_v52 }
 0x214   :  { %v1317_v15 = vpack.c.bf16 %v539_v8, %v523_v60  ;;  %v560_v23 = vpop.permute.xlu0 %559  ;;  %v546_v32 = vpop.permute.xlu1 %545  ;;  %v1331_v34 = vpack.c.bf16 %v542_v13, %v526_v6 }
 0x215   :  { %v553_v19 = vsel %vm122_vm2, %v544_v12, %v546_v32  ;;  %v552_v53 = vsel %vm122_vm2, %v546_v32, %v548_v46 }
 0x216   :  { %1318 = vmatpush1.bf16.msra.mxu0 %v1317_v15  ;;  %1332 = vmatprep.subr.bf16.mxu1 %v1331_v34  ;;  %v556_v43 = vmul.f32 %v553_v19, %v1649_v58 }
 0x217   :  { %1334 = vmatpush1.bf16.msra.mxu1 %v1333_v18 }
 0x218   :  { %v564_v22 = vpop.permute.xlu0 %563  ;;  %v550_v29 = vpop.permute.xlu1 %549 }
 0x219   :  { %v551_v49 = vsel %vm122_vm2, %v548_v46, %v550_v29  ;;  %v554_v52 = vsel %vm122_vm2, %v550_v29, %v544_v12  ;;  %v557_v46 = vmul.f32 %v552_v53, %v1661_v62 }
 0x21a   :  { %v555_v14 = vmul.f32 %v554_v52, %v1658_v61  ;;  %v558_v15 = vmul.f32 %v551_v49, %v1664_v63 }
 0x21c   :  { %v576_v37 = vpop.permute.xlu0 %575  ;;  %v562_v42 = vpop.permute.xlu1 %561 }
 0x21d   :  { %v569_v17 = vsel %vm162_vm3, %v560_v23, %v562_v42  ;;  %v568_v44 = vsel %vm162_vm3, %v562_v42, %v564_v22 }
 0x21e   :  { %v572_v45 = vmul.f32 %v569_v17, %v1653_v59  ;;  %v573_v6 = vmul.f32 %v568_v44, %v1674_v10 }
 0x220   :  { %v580_v54 = vpop.permute.xlu0 %579  ;;  %v566_v55 = vpop.permute.xlu1 %565  ;;  %v1319_v60 = vpack.c.bf16 %v572_v45, %v556_v43  ;;  %v1337_v42 = vpack.c.bf16 %v573_v6, %v557_v46 }
 0x221   :  { %v567_v8 = vsel %vm162_vm3, %v564_v22, %v566_v55  ;;  %v570_v13 = vsel %vm162_vm3, %v566_v55, %v560_v23 }
 0x222   :  { %v571_v12 = vmul.f32 %v570_v13, %v1671_v9  ;;  %v574_v34 = vmul.f32 %v567_v8, %v1681_v16  ;;  %1320 = vmatprep.subr.bf16.mxu0 %v1319_v60 }
 0x224   :  { %v1321_v32 = vpack.c.bf16 %v571_v12, %v555_v14  ;;  %v592_v18 = vpop.permute.xlu0 %591  ;;  %v578_v29 = vpop.permute.xlu1 %577  ;;  %v1335_v19 = vpack.c.bf16 %v574_v34, %v558_v15 }
 0x225   :  { %v584_v22 = vsel %vm202_vm4, %v578_v29, %v580_v54  ;;  %v585_v23 = vsel %vm202_vm4, %v576_v37, %v578_v29 }
 0x226   :  { %v587_v17 = vmul.f32 %v585_v23, %v1702_v47  ;;  %v588_v43 = vmul.f32 %v584_v22, %v1710_v50  ;;  %1322 = vmatpush1.bf16.msra.mxu0 %v1321_v32  ;;  %1336 = vmatprep.subr.bf16.mxu1 %v1335_v19 }
 0x227   :  { %1338 = vmatpush1.bf16.msra.mxu1 %v1337_v42 }
 0x228   :  { %v1325_v44 = vpack.c.bf16 %v587_v17, %v1820_v56  ;;  %v596_v45 = vpop.permute.xlu0 %595  ;;  %v582_v49 = vpop.permute.xlu1 %581  ;;  %v1323_v52 = vpack.c.bf16 %v588_v43, %v1828_v5 }
 0x229   :  { %v583_v53 = vsel %vm202_vm4, %v580_v54, %v582_v49  ;;  %v586_v55 = vsel %vm202_vm4, %v582_v49, %v576_v37 }
 0x22a   :  { %v589_v60 = vmul.f32 %v583_v53, %v1713_v51  ;;  %v590_v6 = vmul.f32 %v586_v55, %v1705_v48  ;;  %1324 = vmatprep.subr.bf16.mxu0 %v1323_v52 }
 0x22b   :  { %1326 = vmatpush1.bf16.msra.mxu0 %v1325_v44 }
 0x22c   :  { %v1341_v8 = vpack.c.bf16 %v589_v60, %v1822_v57  ;;  %v608_v13 = vpop.permute.xlu0 %607  ;;  %v594_v56 = vpop.permute.xlu1 %593  ;;  %v1339_v14 = vpack.c.bf16 %v590_v6, %v1834_v7 }
 0x22d   :  { %v600_v54 = vsel %vm242_vm6, %v594_v56, %v596_v45  ;;  %v601_v37 = vsel %vm242_vm6, %v592_v18, %v594_v56 }
 0x22e   :  { %1340 = vmatprep.subr.bf16.mxu1 %v1339_v14  ;;  %v603_v46 = vmul.f32 %v601_v37, %v1765_v41  ;;  %v604_v7 = vmul.f32 %v600_v54, %v1741_v1 }
 0x22f   :  { %1342 = vmatpush1.bf16.msra.mxu1 %v1341_v8 }
 0x230   :  { %v612_v5 = vpop.permute.xlu0 %611  ;;  %v598_v15 = vpop.permute.xlu1 %597 }
 0x231   :  { %v599_v42 = vsel %vm242_vm6, %v596_v45, %v598_v15  ;;  %v602_v22 = vsel %vm242_vm6, %v598_v15, %v592_v18  ;;  %v639_v15 = vld [vmem:[%s2527_s4] sm:$0xff] }
 0x232   :  { %v605_v52 = vmul.f32 %v599_v42, %v1746_v33  ;;  %v606_v53 = vmul.f32 %v602_v22, %v1738_v0 }
 0x234   :  { %v610_v12 = vpop.permute.xlu1 %609  ;;  %v624_v32 = vpop.permute.xlu0 %623 }
 0x235   :  { %v616_v34 = vsel %vm282_vm5, %v610_v12, %v612_v5  ;;  %v617_v57 = vsel %vm282_vm5, %v608_v13, %v610_v12 }
 0x236   :  { %v619_v29 = vmul.f32 %v617_v57, %v1751_v36  ;;  %v620_v19 = vmul.f32 %v616_v34, %v1759_v39 }
 0x238   :  { %v1329_v23 = vpack.c.bf16 %v619_v29, %v603_v46  ;;  %v614_v17 = vpop.permute.xlu1 %613  ;;  %v1327_v43 = vpack.c.bf16 %v620_v19, %v604_v7  ;;  %v628_v18 = vpop.permute.xlu0 %627  ;;  %v640_v46 = vld [vmem:[%s2527_s4 + $0x8] sm:$0xff] }
 0x239   :  { %v615_v44 = vsel %vm282_vm5, %v612_v5, %v614_v17  ;;  %v618_v49 = vsel %vm282_vm5, %v614_v17, %v608_v13 }
 0x23a   :  { %v621_v55 = vmul.f32 %v615_v44, %v1762_v40  ;;  %v622_v45 = vmul.f32 %v618_v49, %v1756_v38  ;;  %1328 = vmatprep.subr.bf16.mxu0 %v1327_v43 }
 0x23b   :  { %1330 = vmatpush1.bf16.msra.mxu0 %v1329_v23 }
 0x23c   :  { %v1345_v60 = vpack.c.bf16 %v621_v55, %v605_v52  ;;  %v626_v6 = vpop.permute.xlu1 %625  ;;  %v1343_v8 = vpack.c.bf16 %v622_v45, %v606_v53 }
 0x23d   :  { %v632_v56 = vsel %vm322_vm7, %v626_v6, %v628_v18  ;;  %v633_v13 = vsel %vm322_vm7, %v624_v32, %v626_v6 }
 0x23e   :  { %v635_v14 = vmul.f32 %v633_v13, %v1799_v2  ;;  %v636_v5 = vmul.f32 %v632_v56, %v1790_v24  ;;  %1344 = vmatprep.subr.bf16.mxu1 %v1343_v8 }
 0x23f   :  { %1346 = vmatpush1.bf16.msra.mxu1 %v1345_v60 }
 0x240   :  { %675 = vmatprep.subr.mxu0 %v636_v5  ;;  %v630_v54 = vpop.permute.xlu1 %629 }
 0x241   :  { %v631_v37 = vsel %vm322_vm7, %v628_v18, %v630_v54  ;;  %v634_v12 = vsel %vm322_vm7, %v630_v54, %v624_v32  ;;  %676 = vmatpush1.msra.mxu0 %v635_v14 }
 0x242   :  { %v637_v34 = vmul.f32 %v631_v37, %v1796_v3  ;;  %v638_v57 = vmul.f32 %v634_v12, %v1793_v28  ;;  %1275 = vmatmul.mubr.msk.f32.vlgmr.msra.gmra.mrb[2].mxu0 %vm361_vm8, %v639_v15 }
 0x243   :  { %729 = vmatprep.mubr.f32.mxu0 %v1438_v4 }
 0x244   :  { %752 = vmatprep.subr.mxu1 %v638_v57 }
 0x245   :  { %753 = vmatpush1.msra.mxu1 %v637_v34 }
 0x246   :  { %1276 = vmatmul.mubr.msk.f32.gmra.mrb[4].mxu0 %vm361_vm8, %v640_v46  ;;  %1277 = vmatmul.mubr.msk.f32.vlgmr.msra.gmra.mrb[2].mxu1 %vm361_vm8, %v639_v15 }
 0x247   :  { %806 = vmatprep.mubr.f32.mxu1 %v1438_v4 }
 0x249   :  { %v646_v7 = vpop.permute.xlu0 %645 }
 0x24a   :  { %1278 = vmatmul.mubr.msk.f32.gmra.mrb[4].mxu1 %vm361_vm8, %v640_v46 }
 0x251   :  { %v651_v42 = vpop.permute.xlu1 %650 }
 0x315   :  { %v725_v32 = vpop.f32.mrb[2].mxu0 }
 0x316   :  { %v726_v29 = vadd.f32 %v725_v32, %v646_v7  ;;  %v727_v19 = vpop.f32.mrb[3].mxu0 }
 0x317   :  { %v728_v56 = vadd.f32 %v727_v19, %v646_v7  ;;  %v1081_v19 = vld [vmem:[%s2529_s7] sm:$0xff] }
 0x318   :  { %v2010_v22 = vmax.f32 %v726_v29, 0.0 }
 0x319   :  { %v731_v23 = vpop.f32.mrb[4].mxu0  ;;  %v802_v17 = vpop.f32.mrb[2].mxu1  ;;  %v2084_v13 = vmax.f32 %v728_v56, 0.0 }
 0x31a   :  { %v803_v43 = vadd.f32 %v802_v17, %v646_v7  ;;  %v732_v44 = vadd.f32 %v731_v23, %v651_v42  ;;  %v733_v49 = vpop.f32.mrb[5].mxu0  ;;  %821 = vrot.lane.b32.xlu0 %v2010_v22, %s1431_s9  ;;  %v804_v52 = vpop.f32.mrb[3].mxu1  ;;  %v1082_v17 = vld [vmem:[%s2529_s7 + $0x8] sm:$0xff] }
 0x31b   :  { %v734_v14 = vadd.f32 %v733_v49, %v651_v42  ;;  %v805_v5 = vadd.f32 %v804_v52, %v646_v7  ;;  %v1078_v7 = vld [vmem:[%s2528_s6 + $0x8] sm:$0xff] }
 0x31c   :  { %v2014_v53 = vmax.f32 %v803_v43, 0.0  ;;  %v2016_v4 = vmax.f32 %v732_v44, 0.0  ;;  %1279 = vmatprep.mubr.msk.f32.mxu0 %vm1093_vm9, %v1078_v7  ;;  %1281 = vmatprep.mubr.msk.f32.mxu1 %vm1093_vm9, %v1078_v7 }
 0x31d   :  { %v808_v55 = vpop.f32.mrb[4].mxu1  ;;  %v2090_v15 = vmax.f32 %v734_v14, 0.0  ;;  %v2092_v54 = vmax.f32 %v805_v5, 0.0 }
 0x31e   :  { %2580 = vst [vmem:[#allocation14_spill] sm:$0xff] %v2014_v53  ;;  %v809_v45 = vadd.f32 %v808_v55, %v651_v42  ;;  %v810_v18 = vpop.f32.mrb[5].mxu1  ;;  %829 = vrot.lane.b32.xlu0 %v2014_v53, %s1431_s9  ;;  %823 = vrot.lane.b32.xlu1 %v2016_v4, %s1431_s9 }
 0x31f   :  { %v811_v37 = vadd.f32 %v810_v18, %v651_v42 }
 0x320   :  { %v2024_v6 = vmax.f32 %v809_v45, 0.0 }
 0x321   :  { %v2098_v12 = vmax.f32 %v811_v37, 0.0 }
 0x322   :  { %2581 = vst [vmem:[#allocation15_spill] sm:$0xff] %v2024_v6  ;;  %853 = vrot.lane.b32.xlu0 %v2010_v22, %s1432_s14  ;;  %831 = vrot.lane.b32.xlu1 %v2024_v6, %s1431_s9 }
 0x326   :  { %861 = vrot.lane.b32.xlu0 %v2014_v53, %s1432_s14  ;;  %855 = vrot.lane.b32.xlu1 %v2016_v4, %s1432_s14 }
 0x32a   :  { %885 = vrot.lane.b32.xlu0 %v2010_v22, %s1433_s0  ;;  %863 = vrot.lane.b32.xlu1 %v2024_v6, %s1432_s14 }
 0x32e   :  { %893 = vrot.lane.b32.xlu0 %v2014_v53, %s1433_s0  ;;  %887 = vrot.lane.b32.xlu1 %v2016_v4, %s1433_s0 }
 0x332   :  { %917 = vrot.lane.b32.xlu0 %v2010_v22, %s1434_s15  ;;  %895 = vrot.lane.b32.xlu1 %v2024_v6, %s1433_s0 }
 0x336   :  { %925 = vrot.lane.b32.xlu0 %v2014_v53, %s1434_s15  ;;  %919 = vrot.lane.b32.xlu1 %v2016_v4, %s1434_s15 }
 0x33a   :  { %949 = vrot.lane.b32.xlu0 %v2010_v22, %s1435_s16  ;;  %927 = vrot.lane.b32.xlu1 %v2024_v6, %s1434_s15 }
 0x33e   :  { %957 = vrot.lane.b32.xlu0 %v2014_v53, %s1435_s16  ;;  %951 = vrot.lane.b32.xlu1 %v2016_v4, %s1435_s16 }
 0x342   :  { %981 = vrot.lane.b32.xlu0 %v2010_v22, %s1436_s17  ;;  %959 = vrot.lane.b32.xlu1 %v2024_v6, %s1435_s16 }
 0x346   :  { %989 = vrot.lane.b32.xlu0 %v2014_v53, %s1436_s17  ;;  %983 = vrot.lane.b32.xlu1 %v2016_v4, %s1436_s17 }
 0x34a   :  { %1013 = vrot.lane.b32.xlu0 %v2010_v22, %s1437_s18  ;;  %991 = vrot.lane.b32.xlu1 %v2024_v6, %s1436_s17 }
 0x34e   :  { %1021 = vrot.lane.b32.xlu0 %v2014_v53, %s1437_s18  ;;  %1015 = vrot.lane.b32.xlu1 %v2016_v4, %s1437_s18 }
 0x352   :  { %1045 = vrot.lane.b32.xlu0 %v2010_v22, %s1440_s19  ;;  %1023 = vrot.lane.b32.xlu1 %v2024_v6, %s1437_s18 }
 0x356   :  { %1053 = vrot.lane.b32.xlu0 %v2014_v53, %s1440_s19  ;;  %1047 = vrot.lane.b32.xlu1 %v2016_v4, %s1440_s19 }
 0x35a   :  { %825 = vrot.lane.b32.xlu0 %v2084_v13, %s1431_s9  ;;  %1055 = vrot.lane.b32.xlu1 %v2024_v6, %s1440_s19 }
 0x35e   :  { %833 = vrot.lane.b32.xlu0 %v2092_v54, %s1431_s9  ;;  %827 = vrot.lane.b32.xlu1 %v2090_v15, %s1431_s9 }
 0x362   :  { %857 = vrot.lane.b32.xlu0 %v2084_v13, %s1432_s14  ;;  %835 = vrot.lane.b32.xlu1 %v2098_v12, %s1431_s9 }
 0x366   :  { %865 = vrot.lane.b32.xlu0 %v2092_v54, %s1432_s14  ;;  %859 = vrot.lane.b32.xlu1 %v2090_v15, %s1432_s14 }
 0x36a   :  { %889 = vrot.lane.b32.xlu0 %v2084_v13, %s1433_s0  ;;  %867 = vrot.lane.b32.xlu1 %v2098_v12, %s1432_s14 }
 0x36e   :  { %897 = vrot.lane.b32.xlu0 %v2092_v54, %s1433_s0  ;;  %891 = vrot.lane.b32.xlu1 %v2090_v15, %s1433_s0 }
 0x372   :  { %921 = vrot.lane.b32.xlu0 %v2084_v13, %s1434_s15  ;;  %899 = vrot.lane.b32.xlu1 %v2098_v12, %s1433_s0 }
 0x376   :  { %929 = vrot.lane.b32.xlu0 %v2092_v54, %s1434_s15  ;;  %923 = vrot.lane.b32.xlu1 %v2090_v15, %s1434_s15 }
 0x37a   :  { %953 = vrot.lane.b32.xlu0 %v2084_v13, %s1435_s16  ;;  %931 = vrot.lane.b32.xlu1 %v2098_v12, %s1434_s15 }
 0x37e   :  { %961 = vrot.lane.b32.xlu0 %v2092_v54, %s1435_s16  ;;  %955 = vrot.lane.b32.xlu1 %v2090_v15, %s1435_s16 }
 0x382   :  { %985 = vrot.lane.b32.xlu0 %v2084_v13, %s1436_s17  ;;  %963 = vrot.lane.b32.xlu1 %v2098_v12, %s1435_s16 }
 0x386   :  { %993 = vrot.lane.b32.xlu0 %v2092_v54, %s1436_s17  ;;  %987 = vrot.lane.b32.xlu1 %v2090_v15, %s1436_s17 }
 0x38a   :  { %1017 = vrot.lane.b32.xlu0 %v2084_v13, %s1437_s18  ;;  %995 = vrot.lane.b32.xlu1 %v2098_v12, %s1436_s17 }
 0x38c   :  { %v822_v34 = vpop.permute.xlu0 %821 }
 0x38e   :  { %1025 = vrot.lane.b32.xlu0 %v2092_v54, %s1437_s18  ;;  %1019 = vrot.lane.b32.xlu1 %v2090_v15, %s1437_s18 }
 0x390   :  { %v830_v57 = vpop.permute.xlu0 %829  ;;  %v2148_v46 = vpop.permute.xlu1 %823 }
 0x392   :  { %1049 = vrot.lane.b32.xlu0 %v2084_v13, %s1440_s19  ;;  %1027 = vrot.lane.b32.xlu1 %v2098_v12, %s1437_s18 }
 0x394   :  { %v2159_v32 = vpop.permute.xlu0 %853  ;;  %v832_v29 = vpop.permute.xlu1 %831 }
 0x396   :  { %1057 = vrot.lane.b32.xlu0 %v2092_v54, %s1440_s19  ;;  %1051 = vrot.lane.b32.xlu1 %v2090_v15, %s1440_s19 }
 0x398   :  { %v2168_v42 = vpop.permute.xlu0 %861  ;;  %v2170_v23 = vpop.permute.xlu1 %855 }
 0x39a   :  { %1085 = vperm.xlu0 %1429, %v1081_v19   ;;  %1059 = vrot.lane.b32.xlu1 %v2098_v12, %s1440_s19 }
 0x39c   :  { %v2177_v43 = vpop.permute.xlu0 %885  ;;  %v2179_v44 = vpop.permute.xlu1 %863 }
 0x39e   :  { %1090 = vperm.xlu1 %1430, %v1082_v17  }
 0x3a0   :  { %v2181_v49 = vpop.permute.xlu0 %893  ;;  %v2183_v52 = vpop.permute.xlu1 %887 }
 0x3a4   :  { %v2185_v55 = vpop.permute.xlu0 %917  ;;  %v2187_v45 = vpop.permute.xlu1 %895 }
 0x3a8   :  { %v2189_v18 = vpop.permute.xlu0 %925  ;;  %v2191_v56 = vpop.permute.xlu1 %919 }
 0x3ac   :  { %v2193_v14 = vpop.permute.xlu0 %949  ;;  %v2195_v5 = vpop.permute.xlu1 %927 }
 0x3b0   :  { %v2197_v37 = vpop.permute.xlu0 %957  ;;  %v2199_v7 = vpop.permute.xlu1 %951 }
 0x3b4   :  { %v2201_v19 = vpop.permute.xlu0 %981  ;;  %v2203_v17 = vpop.permute.xlu1 %959 }
 0x3b5   :  { %2582 = vst [vmem:[#allocation16_spill] sm:$0xff] %v2201_v19 }
 0x3b8   :  { %v2205_v8 = vpop.permute.xlu0 %989  ;;  %v2207_v60 = vpop.permute.xlu1 %983 }
 0x3b9   :  { %2583 = vst [vmem:[#allocation17_spill] sm:$0xff] %v2207_v60 }
 0x3bc   :  { %v2209_v28 = vpop.permute.xlu0 %1013  ;;  %v2211_v3 = vpop.permute.xlu1 %991 }
 0x3bd   :  { %2584 = vst [vmem:[#allocation18_spill] sm:$0xff] %v2209_v28  ;;  %2585 = vst [vmem:[#allocation19_spill] sm:$0xff] %v2211_v3 }
 0x3c0   :  { %v2213_v24 = vpop.permute.xlu0 %1021  ;;  %v2215_v2 = vpop.permute.xlu1 %1015 }
 0x3c1   :  { %2586 = vst [vmem:[#allocation20_spill] sm:$0xff] %v2213_v24  ;;  %2587 = vst [vmem:[#allocation21_spill] sm:$0xff] %v2215_v2 }
 0x3c4   :  { %v2217_v38 = vpop.permute.xlu0 %1045  ;;  %v2219_v40 = vpop.permute.xlu1 %1023 }
 0x3c5   :  { %2588 = vst [vmem:[#allocation22_spill] sm:$0xff] %v2217_v38  ;;  %2589 = vst [vmem:[#allocation23_spill] sm:$0xff] %v2219_v40 }
 0x3c8   :  { %v2221_v39 = vpop.permute.xlu0 %1053  ;;  %v2223_v36 = vpop.permute.xlu1 %1047 }
 0x3c9   :  { %2590 = vst [vmem:[#allocation24_spill] sm:$0xff] %v2221_v39  ;;  %2591 = vst [vmem:[#allocation25_spill] sm:$0xff] %v2223_v36 }
 0x3cc   :  { %v826_v0 = vpop.permute.xlu0 %825  ;;  %v2225_v33 = vpop.permute.xlu1 %1055 }
 0x3cd   :  { %2592 = vst [vmem:[#allocation26_spill] sm:$0xff] %v2225_v33  ;;  %v839_v28 = vsel %vm43_vm0, %v826_v0, %v830_v57  ;;  %v841_v1 = vsel %vm43_vm0, %v822_v34, %v826_v0 }
 0x3ce   :  { %v846_v36 = vmul.f32 %v841_v1, %v1594_v20  ;;  %v847_v2 = vmul.f32 %v839_v28, %v1618_v31 }
 0x3d0   :  { %v834_v24 = vpop.permute.xlu0 %833  ;;  %v828_v41 = vpop.permute.xlu1 %827 }
 0x3d1   :  { %v840_v38 = vsel %vm43_vm0, %v828_v41, %v832_v29  ;;  %v842_v39 = vsel %vm43_vm0, %v2148_v46, %v828_v41  ;;  %v837_v0 = vsel %vm43_vm0, %v830_v57, %v834_v24  ;;  %v843_v60 = vsel %vm43_vm0, %v834_v24, %v822_v34 }
 0x3d2   :  { %v850_v33 = vmul.f32 %v842_v39, %v1594_v20  ;;  %v851_v40 = vmul.f32 %v840_v38, %v1618_v31  ;;  %v845_v20 = vmul.f32 %v843_v60, %v1602_v25  ;;  %v848_v31 = vmul.f32 %v837_v0, %v1608_v27 }
 0x3d4   :  { %v1385_v3 = vpack.c.bf16 %v851_v40, %v847_v2  ;;  %v858_v53 = vpop.permute.xlu0 %857  ;;  %v836_v6 = vpop.permute.xlu1 %835  ;;  %v1347_v19 = vpack.c.bf16 %v850_v33, %v846_v36 }
 0x3d5   :  { %v838_v41 = vsel %vm43_vm0, %v832_v29, %v836_v6  ;;  %v844_v1 = vsel %vm43_vm0, %v836_v6, %v2148_v46  ;;  %v871_v33 = vsel %vm82_vm1, %v858_v53, %v2168_v42  ;;  %v873_v36 = vsel %vm82_vm1, %v2159_v32, %v858_v53 }
 0x3d6   :  { %v849_v38 = vmul.f32 %v844_v1, %v1602_v25  ;;  %v852_v39 = vmul.f32 %v838_v41, %v1608_v27  ;;  %1348 = vmatprep.subr.bf16.mxu0 %v1347_v19  ;;  %v878_v27 = vmul.f32 %v873_v36, %v1597_v21  ;;  %v879_v6 = vmul.f32 %v871_v33, %v1625_v35 }
 0x3d8   :  { %v1349_v40 = vpack.c.bf16 %v849_v38, %v845_v20  ;;  %v866_v24 = vpop.permute.xlu0 %865  ;;  %v860_v28 = vpop.permute.xlu1 %859  ;;  %v1383_v2 = vpack.c.bf16 %v852_v39, %v848_v31 }
 0x3d9   :  { %v872_v60 = vsel %vm82_vm1, %v860_v28, %v2179_v44  ;;  %v874_v25 = vsel %vm82_vm1, %v2170_v23, %v860_v28  ;;  %v869_v57 = vsel %vm82_vm1, %v2168_v42, %v866_v24  ;;  %v875_v46 = vsel %vm82_vm1, %v866_v24, %v2159_v32 }
 0x3da   :  { %v882_v34 = vmul.f32 %v874_v25, %v1597_v21  ;;  %v883_v53 = vmul.f32 %v872_v60, %v1625_v35  ;;  %1350 = vmatpush1.bf16.msra.mxu0 %v1349_v40  ;;  %1384 = vmatprep.subr.bf16.mxu1 %v1383_v2  ;;  %v877_v42 = vmul.f32 %v875_v46, %v1605_v26 }
 0x3db   :  { %1386 = vmatpush1.bf16.msra.mxu1 %v1385_v3  ;;  %v880_v1 = vmul.f32 %v869_v57, %v1615_v30 }
 0x3dc   :  { %v1389_v29 = vpack.c.bf16 %v883_v53, %v879_v6  ;;  %v890_v19 = vpop.permute.xlu0 %889  ;;  %v868_v0 = vpop.permute.xlu1 %867  ;;  %v1351_v41 = vpack.c.bf16 %v882_v34, %v878_v27 }
 0x3dd   :  { %v870_v21 = vsel %vm82_vm1, %v2179_v44, %v868_v0  ;;  %v876_v35 = vsel %vm82_vm1, %v868_v0, %v2170_v23  ;;  %v903_v3 = vsel %vm122_vm2, %v890_v19, %v2181_v49  ;;  %v905_v44 = vsel %vm122_vm2, %v2177_v43, %v890_v19 }
 0x3de   :  { %v881_v32 = vmul.f32 %v876_v35, %v1605_v26  ;;  %v884_v20 = vmul.f32 %v870_v21, %v1615_v30  ;;  %1352 = vmatprep.subr.bf16.mxu0 %v1351_v41  ;;  %v910_v30 = vmul.f32 %v905_v44, %v1649_v58  ;;  %v911_v36 = vmul.f32 %v903_v3, %v1661_v62 }
 0x3e0   :  { %v1353_v31 = vpack.c.bf16 %v881_v32, %v877_v42  ;;  %v898_v38 = vpop.permute.xlu0 %897  ;;  %v892_v23 = vpop.permute.xlu1 %891  ;;  %v1387_v39 = vpack.c.bf16 %v884_v20, %v880_v1 }
 0x3e1   :  { %v904_v33 = vsel %vm122_vm2, %v892_v23, %v2187_v45  ;;  %v906_v26 = vsel %vm122_vm2, %v2183_v52, %v892_v23  ;;  %v901_v28 = vsel %vm122_vm2, %v2181_v49, %v898_v38  ;;  %v907_v2 = vsel %vm122_vm2, %v898_v38, %v2177_v43 }
 0x3e2   :  { %v914_v40 = vmul.f32 %v906_v26, %v1649_v58  ;;  %v915_v24 = vmul.f32 %v904_v33, %v1661_v62  ;;  %1354 = vmatpush1.bf16.msra.mxu0 %v1353_v31  ;;  %1388 = vmatprep.subr.bf16.mxu1 %v1387_v39  ;;  %v909_v49 = vmul.f32 %v907_v2, %v1658_v61 }
 0x3e3   :  { %1390 = vmatpush1.bf16.msra.mxu1 %v1389_v29  ;;  %v912_v34 = vmul.f32 %v901_v28, %v1664_v63 }
 0x3e4   :  { %v1393_v60 = vpack.c.bf16 %v915_v24, %v911_v36  ;;  %v922_v25 = vpop.permute.xlu0 %921  ;;  %v900_v27 = vpop.permute.xlu1 %899  ;;  %v1355_v6 = vpack.c.bf16 %v914_v40, %v910_v30 }
 0x3e5   :  { %v902_v58 = vsel %vm122_vm2, %v2187_v45, %v900_v27  ;;  %v908_v62 = vsel %vm122_vm2, %v900_v27, %v2183_v52  ;;  %v935_v57 = vsel %vm162_vm3, %v922_v25, %v2189_v18  ;;  %v937_v45 = vsel %vm162_vm3, %v2185_v55, %v922_v25 }
 0x3e6   :  { %v913_v43 = vmul.f32 %v908_v62, %v1658_v61  ;;  %v916_v53 = vmul.f32 %v902_v58, %v1664_v63  ;;  %1356 = vmatprep.subr.bf16.mxu0 %v1355_v6  ;;  %v942_v63 = vmul.f32 %v937_v45, %v1653_v59  ;;  %v943_v41 = vmul.f32 %v935_v57, %v1674_v10  ;;  %v2594_v58 = vld [vmem:[#allocation16_spill] sm:$0xff]  ;;  %v2599_v45 = vld [vmem:[#allocation17_spill] sm:$0xff] }
 0x3e8   :  { %v1357_v46 = vpack.c.bf16 %v913_v43, %v909_v49  ;;  %v930_v29 = vpop.permute.xlu0 %929  ;;  %v924_v52 = vpop.permute.xlu1 %923  ;;  %v1391_v19 = vpack.c.bf16 %v916_v53, %v912_v34  ;;  %v2595_v34 = vld [vmem:[#allocation15_spill] sm:$0xff]  ;;  %v2596_v43 = vld [vmem:[#allocation14_spill] sm:$0xff] }
 0x3e9   :  { %v936_v0 = vsel %vm162_vm3, %v924_v52, %v2195_v5  ;;  %v938_v61 = vsel %vm162_vm3, %v2191_v56, %v924_v52  ;;  %v933_v42 = vsel %vm162_vm3, %v2189_v18, %v930_v29  ;;  %v939_v1 = vsel %vm162_vm3, %v930_v29, %v2185_v55  ;;  %v2600_v29 = vld [vmem:[#allocation9_spill] sm:$0xff] }
 0x3ea   :  { %v946_v21 = vmul.f32 %v938_v61, %v1653_v59  ;;  %v947_v35 = vmul.f32 %v936_v0, %v1674_v10  ;;  %1358 = vmatpush1.bf16.msra.mxu0 %v1357_v46  ;;  %1392 = vmatprep.subr.bf16.mxu1 %v1391_v19  ;;  %v941_v18 = vmul.f32 %v939_v1, %v1671_v9  ;;  %v2601_v19 = vld [vmem:[#allocation3_spill] sm:$0xff] }
 0x3eb   :  { %1394 = vmatpush1.bf16.msra.mxu1 %v1393_v60  ;;  %v944_v31 = vmul.f32 %v933_v42, %v1681_v16 }
 0x3ec   :  { %v1397_v32 = vpack.c.bf16 %v947_v35, %v943_v41  ;;  %v954_v20 = vpop.permute.xlu0 %953  ;;  %v932_v3 = vpop.permute.xlu1 %931  ;;  %v1359_v44 = vpack.c.bf16 %v946_v21, %v942_v63 }
 0x3ed   :  { %v934_v59 = vsel %vm162_vm3, %v2195_v5, %v932_v3  ;;  %v940_v10 = vsel %vm162_vm3, %v932_v3, %v2191_v56  ;;  %v967_v23 = vsel %vm202_vm4, %v954_v20, %v2197_v37 }
 0x3ee   :  { %v945_v55 = vmul.f32 %v940_v10, %v1671_v9  ;;  %v948_v38 = vmul.f32 %v934_v59, %v1681_v16  ;;  %1360 = vmatprep.subr.bf16.mxu0 %v1359_v44  ;;  %v1363_v9 = vpack.c.bf16 %v2090_v15, %v2084_v13  ;;  %v969_v16 = vsel %vm202_vm4, %v2193_v14, %v954_v20  ;;  %v2602_v44 = vld [vmem:[#allocation4_spill] sm:$0xff]  ;;  %v2603_v59 = vld [vmem:[#allocation2_spill] sm:$0xff] }
 0x3ef   :  { %v974_v36 = vmul.f32 %v967_v23, %v1710_v50  ;;  %v1399_v13 = vpack.c.bf16 %v2098_v12, %v2092_v54  ;;  %v973_v25 = vmul.f32 %v969_v16, %v1702_v47  ;;  %v2605_v23 = vld [vmem:[#allocation18_spill] sm:$0xff]  ;;  %v2607_v16 = vld [vmem:[#allocation21_spill] sm:$0xff] }
 0x3f0   :  { %v1361_v39 = vpack.c.bf16 %v945_v55, %v941_v18  ;;  %v962_v33 = vpop.permute.xlu0 %961  ;;  %v956_v5 = vpop.permute.xlu1 %955  ;;  %v1395_v26 = vpack.c.bf16 %v948_v38, %v944_v31  ;;  %v2604_v55 = vld [vmem:[#allocation20_spill] sm:$0xff] }
 0x3f1   :  { %v968_v56 = vsel %vm202_vm4, %v956_v5, %v2203_v17  ;;  %v970_v30 = vsel %vm202_vm4, %v2199_v7, %v956_v5  ;;  %v965_v24 = vsel %vm202_vm4, %v2197_v37, %v962_v33  ;;  %v971_v28 = vsel %vm202_vm4, %v962_v33, %v2193_v14 }
 0x3f2   :  { %v978_v40 = vmul.f32 %v968_v56, %v1710_v50  ;;  %1362 = vmatpush1.bf16.msra.mxu0 %v1361_v39  ;;  %1396 = vmatprep.subr.bf16.mxu1 %v1395_v26  ;;  %v977_v15 = vmul.f32 %v970_v30, %v1702_v47  ;;  %v975_v27 = vmul.f32 %v965_v24, %v1713_v51  ;;  %v2606_v30 = vld [vmem:[#allocation23_spill] sm:$0xff] }
 0x3f3   :  { %1364 = vmatprep.subr.bf16.mxu0 %v1363_v9  ;;  %1398 = vmatpush1.bf16.msra.mxu1 %v1397_v32  ;;  %v976_v54 = vmul.f32 %v971_v28, %v1705_v48  ;;  %v2593_v47 = vpack.c.bf16 %v2016_v4, %v2010_v22  ;;  %v2598_v22 = vld [vmem:[#allocation19_spill] sm:$0xff] }
 0x3f4   :  { %v986_v2 = vpop.permute.xlu0 %985  ;;  %v964_v60 = vpop.permute.xlu1 %963  ;;  %v1367_v50 = vpack.c.bf16 %v978_v40, %v974_v36  ;;  %1400 = vmatprep.subr.bf16.mxu1 %v1399_v13  ;;  %v1369_v62 = vpack.c.bf16 %v977_v15, %v973_v25  ;;  %v2608_v40 = vld [vmem:[#allocation5_spill] sm:$0xff]  ;;  %v2609_v28 = vld [vmem:[#allocation7_spill] sm:$0xff] }
 0x3f5   :  { %v966_v37 = vsel %vm202_vm4, %v2203_v17, %v964_v60  ;;  %v972_v14 = vsel %vm202_vm4, %v964_v60, %v2199_v7  ;;  %v999_v17 = vsel %vm242_vm6, %v986_v2, %v2205_v8  ;;  %v1001_v7 = vsel %vm242_vm6, %v2594_v58, %v986_v2 }
 0x3f6   :  { %v979_v12 = vmul.f32 %v966_v37, %v1713_v51  ;;  %v980_v6 = vmul.f32 %v972_v14, %v1705_v48  ;;  %1366 = vmatpush1.bf16.msra.mxu0 %v2593_v47  ;;  %v2597_v51 = vpack.c.bf16 %v2595_v34, %v2596_v43  ;;  %v1005_v52 = vmul.f32 %v1001_v7, %v2600_v29  ;;  %v2613_v43 = vld [vmem:[#allocation22_spill] sm:$0xff] }
 0x3f7   :  { %1368 = vmatprep.subr.bf16.mxu0 %v1367_v50  ;;  %v1006_v0 = vmul.f32 %v999_v17, %v2601_v19  ;;  %v2611_v17 = vld [vmem:[#allocation6_spill] sm:$0xff] }
 0x3f8   :  { %v1405_v49 = vpack.c.bf16 %v979_v12, %v975_v27  ;;  %1402 = vmatpush1.bf16.msra.mxu1 %v2597_v51  ;;  %v994_v48 = vpop.permute.xlu0 %993  ;;  %v988_v53 = vpop.permute.xlu1 %987  ;;  %v1403_v57 = vpack.c.bf16 %v980_v6, %v976_v54  ;;  %v2610_v6 = vld [vmem:[#allocation8_spill] sm:$0xff] }
 0x3f9   :  { %v1000_v4 = vsel %vm242_vm6, %v988_v53, %v2598_v22  ;;  %v1002_v46 = vsel %vm242_vm6, %v2599_v45, %v988_v53  ;;  %v997_v41 = vsel %vm242_vm6, %v2205_v8, %v994_v48  ;;  %v1003_v21 = vsel %vm242_vm6, %v994_v48, %v2594_v58 }
 0x3fa   :  { %v1009_v61 = vmul.f32 %v1002_v46, %v2600_v29  ;;  %v1010_v63 = vmul.f32 %v1000_v4, %v2601_v19  ;;  %1370 = vmatpush1.bf16.msra.mxu0 %v1369_v62  ;;  %1404 = vmatprep.subr.bf16.mxu1 %v1403_v57  ;;  %v1007_v8 = vmul.f32 %v997_v41, %v2602_v44  ;;  %v2614_v4 = vld [vmem:[#allocation26_spill] sm:$0xff]  ;;  %v2615_v46 = vld [vmem:[#allocation25_spill] sm:$0xff] }
 0x3fb   :  { %v1008_v10 = vmul.f32 %v1003_v21, %v2603_v59 }
 0x3fc   :  { %v1373_v35 = vpack.c.bf16 %v1009_v61, %v1005_v52  ;;  %1406 = vmatpush1.bf16.msra.mxu1 %v1405_v49  ;;  %v1018_v42 = vpop.permute.xlu0 %1017  ;;  %v996_v1 = vpop.permute.xlu1 %995  ;;  %v1371_v32 = vpack.c.bf16 %v1010_v63, %v1006_v0  ;;  %v2612_v49 = vld [vmem:[#allocation24_spill] sm:$0xff]  ;;  %v2616_v52 = vld [vmem:[#allocation13_spill] sm:$0xff]  ;;  %v2617_v0 = vld [vmem:[#allocation10_spill] sm:$0xff] }
 0x3fd   :  { %v998_v20 = vsel %vm242_vm6, %v2598_v22, %v996_v1  ;;  %v1004_v3 = vsel %vm242_vm6, %v996_v1, %v2599_v45  ;;  %v1031_v38 = vsel %vm282_vm5, %v1018_v42, %v2604_v55  ;;  %v1033_v39 = vsel %vm282_vm5, %v2605_v23, %v1018_v42 }
 0x3fe   :  { %v1011_v18 = vmul.f32 %v998_v20, %v2602_v44  ;;  %v1012_v31 = vmul.f32 %v1004_v3, %v2603_v59  ;;  %1372 = vmatprep.subr.bf16.mxu0 %v1371_v32  ;;  %v1037_v24 = vmul.f32 %v1033_v39, %v2608_v40  ;;  %v1038_v13 = vmul.f32 %v1031_v38, %v2609_v28  ;;  %v2618_v44 = vld [vmem:[#allocation12_spill] sm:$0xff]  ;;  %v2619_v59 = vld [vmem:[#allocation11_spill] sm:$0xff] }
 0x3ff   :  { %1374 = vmatpush1.bf16.msra.mxu0 %v1373_v35  ;;  %v1079_v39 = vld [vmem:[%s2528_s6 + $0x10] sm:$0xff] }
 0x400   :  { %v1409_v33 = vpack.c.bf16 %v1011_v18, %v1007_v8  ;;  %v1026_v5 = vpop.permute.xlu0 %1025  ;;  %v1020_v26 = vpop.permute.xlu1 %1019  ;;  %v1407_v56 = vpack.c.bf16 %v1012_v31, %v1008_v10 }
 0x401   :  { %v1032_v9 = vsel %vm282_vm5, %v1020_v26, %v2606_v30  ;;  %v1034_v36 = vsel %vm282_vm5, %v2607_v16, %v1020_v26  ;;  %v1029_v60 = vsel %vm282_vm5, %v2604_v55, %v1026_v5  ;;  %v1035_v50 = vsel %vm282_vm5, %v1026_v5, %v2605_v23  ;;  %v1077_v55 = vld [vmem:[%s2528_s6] sm:$0xff] }
 0x402   :  { %v1041_v15 = vmul.f32 %v1034_v36, %v2608_v40  ;;  %v1042_v2 = vmul.f32 %v1032_v9, %v2609_v28  ;;  %1408 = vmatprep.subr.bf16.mxu1 %v1407_v56  ;;  %v1039_v47 = vmul.f32 %v1029_v60, %v2610_v6  ;;  %v1040_v58 = vmul.f32 %v1035_v50, %v2611_v17 }
 0x403   :  { %1410 = vmatpush1.bf16.msra.mxu1 %v1409_v33 }
 0x404   :  { %v1377_v25 = vpack.c.bf16 %v1041_v15, %v1037_v24  ;;  %v1050_v37 = vpop.permute.xlu0 %1049  ;;  %v1028_v14 = vpop.permute.xlu1 %1027  ;;  %v1375_v27 = vpack.c.bf16 %v1042_v2, %v1038_v13 }
 0x405   :  { %v1030_v54 = vsel %vm282_vm5, %v2606_v30, %v1028_v14  ;;  %v1036_v12 = vsel %vm282_vm5, %v1028_v14, %v2607_v16  ;;  %v1063_v34 = vsel %vm322_vm7, %v1050_v37, %v2612_v49  ;;  %v1065_v51 = vsel %vm322_vm7, %v2613_v43, %v1050_v37 }
 0x406   :  { %v1043_v7 = vmul.f32 %v1030_v54, %v2610_v6  ;;  %v1044_v62 = vmul.f32 %v1036_v12, %v2611_v17  ;;  %1376 = vmatprep.subr.bf16.mxu0 %v1375_v27  ;;  %v1069_v19 = vmul.f32 %v1065_v51, %v2616_v52  ;;  %v1070_v61 = vmul.f32 %v1063_v34, %v2617_v0 }
 0x407   :  { %1378 = vmatpush1.bf16.msra.mxu0 %v1377_v25 }
 0x408   :  { %v1413_v48 = vpack.c.bf16 %v1043_v7, %v1039_v47  ;;  %v1058_v53 = vpop.permute.xlu0 %1057  ;;  %v1052_v57 = vpop.permute.xlu1 %1051  ;;  %v1411_v22 = vpack.c.bf16 %v1044_v62, %v1040_v58 }
 0x409   :  { %v1064_v45 = vsel %vm322_vm7, %v1052_v57, %v2614_v4  ;;  %v1066_v29 = vsel %vm322_vm7, %v2615_v46, %v1052_v57  ;;  %v1061_v21 = vsel %vm322_vm7, %v2612_v49, %v1058_v53  ;;  %v1067_v35 = vsel %vm322_vm7, %v1058_v53, %v2613_v43 }
 0x40a   :  { %v1073_v63 = vmul.f32 %v1066_v29, %v2616_v52  ;;  %v1074_v41 = vmul.f32 %v1064_v45, %v2617_v0  ;;  %1412 = vmatprep.subr.bf16.mxu1 %v1411_v22  ;;  %v1071_v8 = vmul.f32 %v1061_v21, %v2618_v44  ;;  %v1072_v10 = vmul.f32 %v1067_v35, %v2619_v59 }
 0x40b   :  { %1414 = vmatpush1.bf16.msra.mxu1 %v1413_v48 }
 0x40c   :  { %v1381_v42 = vpack.c.bf16 %v1073_v63, %v1069_v19  ;;  %v1060_v1 = vpop.permute.xlu1 %1059  ;;  %v1379_v32 = vpack.c.bf16 %v1074_v41, %v1070_v61 }
 0x40d   :  { %v1062_v20 = vsel %vm322_vm7, %v2614_v4, %v1060_v1  ;;  %v1068_v3 = vsel %vm322_vm7, %v1060_v1, %v2615_v46 }
 0x40e   :  { %v1075_v18 = vmul.f32 %v1062_v20, %v2618_v44  ;;  %v1076_v31 = vmul.f32 %v1068_v3, %v2619_v59  ;;  %1380 = vmatprep.subr.bf16.mxu0 %v1379_v32 }
 0x40f   :  { %1382 = vmatpush1.bf16.msra.mxu0 %v1381_v42 }
 0x410   :  { %v1417_v38 = vpack.c.bf16 %v1075_v18, %v1071_v8  ;;  %v1415_v23 = vpack.c.bf16 %v1076_v31, %v1072_v10 }
 0x412   :  { %1165 = vmatmul.mubr.f32.vlgmr.msra.gmra.mrb[6].mxu0 %v1077_v55  ;;  %1416 = vmatprep.subr.bf16.mxu1 %v1415_v23 }
 0x413   :  { %1418 = vmatpush1.bf16.msra.mxu1 %v1417_v38  ;;  %1280 = vmatprep.mubr.msk.f32.mxu0 %vm1093_vm9, %v1080_v11 }
 0x416   :  { %1171 = vmatmul.mubr.f32.gmra.mrb[8].mxu0 %v1079_v39  ;;  %1242 = vmatmul.mubr.f32.vlgmr.msra.gmra.mrb[6].mxu1 %v1077_v55 }
 0x417   :  { %1282 = vmatprep.mubr.msk.f32.mxu1 %vm1093_vm9, %v1080_v11 }
 0x419   :  { %v1086_v33 = vpop.permute.xlu0 %1085 }
 0x41a   :  { %1248 = vmatmul.mubr.f32.gmra.mrb[8].mxu1 %v1079_v39 }
 0x41d   :  { %v1091_v9 = vpop.permute.xlu1 %1090 }
 0x4e5   :  { %v1166_v5 = vpop.f32.mrb[6].mxu0 }
 0x4e6   :  { %v1167_v26 = vadd.f32 %v1166_v5, %v1086_v33  ;;  %v1168_v56 = vpop.f32.mrb[7].mxu0 }
 0x4e7   :  { %v1169_v30 = vadd.f32 %v1168_v56, %v1086_v33 }
 0x4e8   :  { %1254 = vst [vmem:[%s2530_s8] sm:$0xff] %v1167_v26 }
 0x4e9   :  { %1255 = vst [vmem:[%s2530_s8 + $0x8] sm:$0xff] %v1169_v30  ;;  %v1172_v16 = vpop.f32.mrb[8].mxu0  ;;  %v1243_v36 = vpop.f32.mrb[6].mxu1 }
 0x4ea   :  { %v1173_v40 = vadd.f32 %v1172_v16, %v1091_v9  ;;  %v1244_v24 = vadd.f32 %v1243_v36, %v1086_v33  ;;  %v1174_v28 = vpop.f32.mrb[9].mxu0  ;;  %v1245_v13 = vpop.f32.mrb[7].mxu1 }
 0x4eb   :  { %v1175_v15 = vadd.f32 %v1174_v28, %v1091_v9  ;;  %v1246_v2 = vadd.f32 %v1245_v13, %v1086_v33 }
 0x4ec   :  { %1258 = vst [vmem:[%s2530_s8 + $0x20] sm:$0xff] %v1173_v40  ;;  %1256 = vst [vmem:[%s2530_s8 + $0x10] sm:$0xff] %v1244_v24 }
 0x4ed   :  { %1259 = vst [vmem:[%s2530_s8 + $0x28] sm:$0xff] %v1175_v15  ;;  %1257 = vst [vmem:[%s2530_s8 + $0x18] sm:$0xff] %v1246_v2  ;;  %v1249_v60 = vpop.f32.mrb[8].mxu1 }
 0x4ee   :  { %v1250_v50 = vadd.f32 %v1249_v60, %v1091_v9  ;;  %v1251_v25 = vpop.f32.mrb[9].mxu1 }
 0x4ef   :  { %v1252_v37 = vadd.f32 %v1251_v25, %v1091_v9 }
 0x4f0   :  { %1260 = vst [vmem:[%s2530_s8 + $0x30] sm:$0xff] %v1250_v50 }
 0x4f1   :  { %1261 = vst [vmem:[%s2530_s8 + $0x38] sm:$0xff] %v1252_v37 }

</bundles_post_ra>
